<compile_context>
chip_gen: v7x
topology: tpu7x:2x2x1
jax: 0.10.0
libtpu: 0.0.40
codegen_flags: <defaults>
</compile_context>

<pallas_src>
import jax
import jax.numpy as jnp
from jax.experimental import pallas as pl
from jax.experimental.pallas import tpu as pltpu

IN_SZ = 28 * 28
DIMS = [IN_SZ, 256, 256, 128, 32, 10]          # real (torch) layer sizes
PDIMS = [896, 256, 256, 128, 128, 128]         # lane-padded sizes (multiples of 128)
NUM_LAYERS = len(DIMS) - 1
NUM_CLASSES = DIMS[-1]


def fcn_kernel(x_ref,
               w0_ref, b0_ref,
               w1_ref, b1_ref,
               w2_ref, b2_ref,
               w3_ref, b3_ref,
               w4_ref, b4_ref,
               out_ref):
    # x tile: (TM, 896) bf16; weights bf16 (in, out); biases f32 (1, out).
    h = x_ref[...]

    def linear(h_bf16, w_ref, b_ref):
        # MXU matmul in bf16 with f32 accumulation, bias add in f32.
        return jnp.dot(h_bf16, w_ref[...],
                       preferred_element_type=jnp.float32) + b_ref[...]

    def linear_relu(h_bf16, w_ref, b_ref):
        # ReLU in f32 (VPU), then narrow back to bf16 for the next MXU matmul.
        return jnp.maximum(linear(h_bf16, w_ref, b_ref), 0.0).astype(jnp.bfloat16)

    h = linear_relu(h, w0_ref, b0_ref)
    h = linear_relu(h, w1_ref, b1_ref)
    h = linear_relu(h, w2_ref, b2_ref)
    h = linear_relu(h, w3_ref, b3_ref)
    logits = linear(h, w4_ref, b4_ref)          # f32, (TM, 128)

    # Mask the padded logit columns (>= 10) to -inf so the softmax is unchanged.
    col = jax.lax.broadcasted_iota(jnp.int32, logits.shape, 1)
    logits = jnp.where(col < NUM_CLASSES, logits, -jnp.inf)

    # Numerically stable softmax in f32.
    m = jnp.max(logits, axis=-1, keepdims=True)
    e = jnp.exp(logits - m)
    out_ref[...] = (e / jnp.sum(e, axis=-1, keepdims=True)).astype(out_ref.dtype)


def _prepare_params(params):
    """Pad (in,out)/(1,out) params to lane-aligned PDIMS and cast weights to bf16."""
    flat = []
    for li, (w, b) in enumerate(params):
        din, dout = w.shape
        pin, pout = PDIMS[li], PDIMS[li + 1]
        wp = jnp.zeros((pin, pout), jnp.float32).at[:din, :dout].set(w)
        bp = jnp.zeros((1, pout), jnp.float32).at[:, :dout].set(b)
        flat.append(wp.astype(jnp.bfloat16))    # bf16 weights feed the MXU
        flat.append(bp)                          # biases stay f32
    return flat


def _pick_tm(batch):
    """Tile height: match MXU rows (128 on v5e, 256 on v6e/v7x when batch can fill it)."""
    try:
        kind = jax.devices()[0].device_kind.lower()
        big_mxu = ("v6" in kind) or ("v7" in kind)
    except Exception:
        big_mxu = False
    return 256 if (big_mxu and batch >= 256) else 128


def fcn_forward(x, params, tm=None):
    batch = x.shape[0]
    if tm is None:
        tm = _pick_tm(batch)

    flat_params = _prepare_params(params)

    # Pad batch to a multiple of TM and input features 784 -> 896 with zeros.
    b_pad = pl.cdiv(batch, tm) * tm
    xp = jnp.zeros((b_pad, PDIMS[0]), jnp.bfloat16)
    xp = xp.at[:batch, :DIMS[0]].set(x.astype(jnp.bfloat16))

    grid = (b_pad // tm,)

    # x/out tiled over batch; weights/biases fully resident across grid steps.
    param_specs = []
    for li in range(NUM_LAYERS):
        pin, pout = PDIMS[li], PDIMS[li + 1]
        param_specs.append(pl.BlockSpec((pin, pout), lambda i: (0, 0)))
        param_specs.append(pl.BlockSpec((1, pout), lambda i: (0, 0)))

    flops = 2 * b_pad * sum(PDIMS[i] * PDIMS[i + 1] for i in range(NUM_LAYERS))
    bytes_accessed = (xp.size * 2
                      + sum(int(p.size) * p.dtype.itemsize for p in flat_params)
                      + b_pad * PDIMS[-1] * 4)
    cost = pl.CostEstimate(flops=flops,
                           transcendentals=b_pad * PDIMS[-1],
                           bytes_accessed=bytes_accessed)

    out = pl.pallas_call(
        fcn_kernel,
        out_shape=jax.ShapeDtypeStruct((b_pad, PDIMS[-1]), jnp.float32),
        grid_spec=pltpu.PrefetchScalarGridSpec(
            num_scalar_prefetch=0,
            grid=grid,
            in_specs=[pl.BlockSpec((tm, PDIMS[0]), lambda i: (i, 0))] + param_specs,
            out_specs=pl.BlockSpec((tm, PDIMS[-1]), lambda i: (i, 0)),
        ),
        compiler_params=pltpu.CompilerParams(
            dimension_semantics=("parallel",),
            vmem_limit_bytes=32 * 1024 * 1024,
        ),
        cost_estimate=cost,
    )(xp, *flat_params)

    # Slice back to the real batch and the 10 real classes.
    return out[:batch, :NUM_CLASSES]


def init_params(key):
    """Deterministic init mimicking torch.nn.Linear's uniform(-1/sqrt(in), 1/sqrt(in))."""
    params = []
    for i in range(NUM_LAYERS):
        fan_in, fan_out = DIMS[i], DIMS[i + 1]
        key, kw, kb = jax.random.split(key, 3)
        bound = 1.0 / jnp.sqrt(fan_in)
        # stored as (in, out) so the kernel does x @ W
        w = jax.random.uniform(kw, (fan_in, fan_out), jnp.float32, -bound, bound)
        b = jax.random.uniform(kb, (1, fan_out), jnp.float32, -bound, bound)
        params.append((w, b))
    return params


def _reference_forward(x, params):
    """Pure-JAX reference using the same bf16 weights / f32 accumulation."""
    h = x.astype(jnp.bfloat16)
    for li, (w, b) in enumerate(params):
        y = jnp.dot(h, w.astype(jnp.bfloat16),
                    preferred_element_type=jnp.float32) + b
        if li < NUM_LAYERS - 1:
            h = jnp.maximum(y, 0.0).astype(jnp.bfloat16)
        else:
            logits = y
    return jax.nn.softmax(logits, axis=-1)


if __name__ == "__main__":
    key = jax.random.PRNGKey(0)
    key, kx = jax.random.split(key)
    batch = 8
    x = jax.random.normal(kx, (batch, IN_SZ), jnp.float32)
    params = init_params(key)

    out = fcn_forward(x, params)
    out = jax.block_until_ready(out)

    # sanity: shape, softmax rows sum to ~1, matches a pure-JAX bf16 reference
    assert out.shape == (batch, NUM_CLASSES)
    row_sums = jnp.sum(out, axis=-1)
    assert bool(jnp.all(jnp.abs(row_sums - 1.0) < 1e-4))
    ref = _reference_forward(x, params)
    assert bool(jnp.all(jnp.abs(out - ref) < 1e-2))

    print("KERNEL_OK")
</pallas_src>

<mosaic_0001>
module attributes {stable_mosaic.version = 11 : i64} {
  func.func @fcn_kernel(%arg0: i32, %arg1: memref<128x896xbf16, #tpu.memory_space<vmem>>, %arg2: memref<896x256xbf16, #tpu.memory_space<vmem>>, %arg3: memref<1x256xf32, #tpu.memory_space<vmem>>, %arg4: memref<256x256xbf16, #tpu.memory_space<vmem>>, %arg5: memref<1x256xf32, #tpu.memory_space<vmem>>, %arg6: memref<256x128xbf16, #tpu.memory_space<vmem>>, %arg7: memref<1x128xf32, #tpu.memory_space<vmem>>, %arg8: memref<128x128xbf16, #tpu.memory_space<vmem>>, %arg9: memref<1x128xf32, #tpu.memory_space<vmem>>, %arg10: memref<128x128xbf16, #tpu.memory_space<vmem>>, %arg11: memref<1x128xf32, #tpu.memory_space<vmem>>, %arg12: memref<128x128xf32, #tpu.memory_space<vmem>>) attributes {dimension_semantics = [#tpu.dimension_semantics<parallel>], iteration_bounds = array<i64: 1>, scalar_prefetch = 0 : i64, scratch_operands = 0 : i64, tpu.core_type = #tpu.core_type<tc>, window_params = [{transform_indices = @transform_0, window_bounds = array<i64: 128, 896>}, {pipeline_mode = #tpu.pipeline_mode<synchronous>, transform_indices = @transform_1, window_bounds = array<i64: 896, 256>}, {pipeline_mode = #tpu.pipeline_mode<synchronous>, transform_indices = @transform_2, window_bounds = array<i64: 1, 256>}, {pipeline_mode = #tpu.pipeline_mode<synchronous>, transform_indices = @transform_3, window_bounds = array<i64: 256, 256>}, {pipeline_mode = #tpu.pipeline_mode<synchronous>, transform_indices = @transform_4, window_bounds = array<i64: 1, 256>}, {pipeline_mode = #tpu.pipeline_mode<synchronous>, transform_indices = @transform_5, window_bounds = array<i64: 256, 128>}, {pipeline_mode = #tpu.pipeline_mode<synchronous>, transform_indices = @transform_6, window_bounds = array<i64: 1, 128>}, {pipeline_mode = #tpu.pipeline_mode<synchronous>, transform_indices = @transform_7, window_bounds = array<i64: 128, 128>}, {pipeline_mode = #tpu.pipeline_mode<synchronous>, transform_indices = @transform_8, window_bounds = array<i64: 1, 128>}, {pipeline_mode = #tpu.pipeline_mode<synchronous>, transform_indices = @transform_9, window_bounds = array<i64: 128, 128>}, {pipeline_mode = #tpu.pipeline_mode<synchronous>, transform_indices = @transform_10, window_bounds = array<i64: 1, 128>}, {transform_indices = @transform_11, window_bounds = array<i64: 128, 128>}]} {
    %c0 = arith.constant 0 : index
    %c0_0 = arith.constant 0 : index
    %0 = vector.load %arg1[%c0, %c0_0] : memref<128x896xbf16, #tpu.memory_space<vmem>>, vector<128x896xbf16>
    %c0_1 = arith.constant 0 : index
    %c0_2 = arith.constant 0 : index
    %1 = vector.load %arg2[%c0_1, %c0_2] : memref<896x256xbf16, #tpu.memory_space<vmem>>, vector<896x256xbf16>
    %cst = arith.constant dense<0.000000e+00> : vector<128x256xf32>
    %2 = tpu.matmul %0, %1, %cst {dimension_numbers = #tpu.dot_dimension_numbers<[1], [0], [0], [1], [0, 0, 1, 1], [], []>} : vector<128x896xbf16>, vector<896x256xbf16>, vector<128x256xf32> -> vector<128x256xf32>
    %c0_3 = arith.constant 0 : index
    %c0_4 = arith.constant 0 : index
    %3 = vector.load %arg3[%c0_3, %c0_4] : memref<1x256xf32, #tpu.memory_space<vmem>>, vector<1x256xf32>
    %4 = vector.broadcast %3 : vector<1x256xf32> to vector<128x256xf32>
    %5 = arith.addf %2, %4 : vector<128x256xf32>
    %cst_5 = arith.constant 0.000000e+00 : f32
    %6 = vector.broadcast %cst_5 : f32 to vector<128x256xf32>
    %7 = arith.maximumf %5, %6 : vector<128x256xf32>
    %8 = arith.truncf %7 : vector<128x256xf32> to vector<128x256xbf16>
    %c0_6 = arith.constant 0 : index
    %c0_7 = arith.constant 0 : index
    %9 = vector.load %arg4[%c0_6, %c0_7] : memref<256x256xbf16, #tpu.memory_space<vmem>>, vector<256x256xbf16>
    %cst_8 = arith.constant dense<0.000000e+00> : vector<128x256xf32>
    %10 = tpu.matmul %8, %9, %cst_8 {dimension_numbers = #tpu.dot_dimension_numbers<[1], [0], [0], [1], [0, 0, 1, 1], [], []>} : vector<128x256xbf16>, vector<256x256xbf16>, vector<128x256xf32> -> vector<128x256xf32>
    %c0_9 = arith.constant 0 : index
    %c0_10 = arith.constant 0 : index
    %11 = vector.load %arg5[%c0_9, %c0_10] : memref<1x256xf32, #tpu.memory_space<vmem>>, vector<1x256xf32>
    %12 = vector.broadcast %11 : vector<1x256xf32> to vector<128x256xf32>
    %13 = arith.addf %10, %12 : vector<128x256xf32>
    %cst_11 = arith.constant 0.000000e+00 : f32
    %14 = vector.broadcast %cst_11 : f32 to vector<128x256xf32>
    %15 = arith.maximumf %13, %14 : vector<128x256xf32>
    %16 = arith.truncf %15 : vector<128x256xf32> to vector<128x256xbf16>
    %c0_12 = arith.constant 0 : index
    %c0_13 = arith.constant 0 : index
    %17 = vector.load %arg6[%c0_12, %c0_13] : memref<256x128xbf16, #tpu.memory_space<vmem>>, vector<256x128xbf16>
    %cst_14 = arith.constant dense<0.000000e+00> : vector<128x128xf32>
    %18 = tpu.matmul %16, %17, %cst_14 {dimension_numbers = #tpu.dot_dimension_numbers<[1], [0], [0], [1], [0, 0, 1, 1], [], []>} : vector<128x256xbf16>, vector<256x128xbf16>, vector<128x128xf32> -> vector<128x128xf32>
    %c0_15 = arith.constant 0 : index
    %c0_16 = arith.constant 0 : index
    %19 = vector.load %arg7[%c0_15, %c0_16] : memref<1x128xf32, #tpu.memory_space<vmem>>, vector<1x128xf32>
    %20 = vector.broadcast %19 : vector<1x128xf32> to vector<128x128xf32>
    %21 = arith.addf %18, %20 : vector<128x128xf32>
    %cst_17 = arith.constant 0.000000e+00 : f32
    %22 = vector.broadcast %cst_17 : f32 to vector<128x128xf32>
    %23 = arith.maximumf %21, %22 : vector<128x128xf32>
    %24 = arith.truncf %23 : vector<128x128xf32> to vector<128x128xbf16>
    %c0_18 = arith.constant 0 : index
    %c0_19 = arith.constant 0 : index
    %25 = vector.load %arg8[%c0_18, %c0_19] : memref<128x128xbf16, #tpu.memory_space<vmem>>, vector<128x128xbf16>
    %cst_20 = arith.constant dense<0.000000e+00> : vector<128x128xf32>
    %26 = tpu.matmul %24, %25, %cst_20 {dimension_numbers = #tpu.dot_dimension_numbers<[1], [0], [0], [1], [0, 0, 1, 1], [], []>} : vector<128x128xbf16>, vector<128x128xbf16>, vector<128x128xf32> -> vector<128x128xf32>
    %c0_21 = arith.constant 0 : index
    %c0_22 = arith.constant 0 : index
    %27 = vector.load %arg9[%c0_21, %c0_22] : memref<1x128xf32, #tpu.memory_space<vmem>>, vector<1x128xf32>
    %28 = vector.broadcast %27 : vector<1x128xf32> to vector<128x128xf32>
    %29 = arith.addf %26, %28 : vector<128x128xf32>
    %cst_23 = arith.constant 0.000000e+00 : f32
    %30 = vector.broadcast %cst_23 : f32 to vector<128x128xf32>
    %31 = arith.maximumf %29, %30 : vector<128x128xf32>
    %32 = arith.truncf %31 : vector<128x128xf32> to vector<128x128xbf16>
    %c0_24 = arith.constant 0 : index
    %c0_25 = arith.constant 0 : index
    %33 = vector.load %arg10[%c0_24, %c0_25] : memref<128x128xbf16, #tpu.memory_space<vmem>>, vector<128x128xbf16>
    %cst_26 = arith.constant dense<0.000000e+00> : vector<128x128xf32>
    %34 = tpu.matmul %32, %33, %cst_26 {dimension_numbers = #tpu.dot_dimension_numbers<[1], [0], [0], [1], [0, 0, 1, 1], [], []>} : vector<128x128xbf16>, vector<128x128xbf16>, vector<128x128xf32> -> vector<128x128xf32>
    %c0_27 = arith.constant 0 : index
    %c0_28 = arith.constant 0 : index
    %35 = vector.load %arg11[%c0_27, %c0_28] : memref<1x128xf32, #tpu.memory_space<vmem>>, vector<1x128xf32>
    %36 = vector.broadcast %35 : vector<1x128xf32> to vector<128x128xf32>
    %37 = arith.addf %34, %36 : vector<128x128xf32>
    %38 = tpu.iota {dimensions = array<i32: 1>} : vector<128x128xi32>
    %c10_i32 = arith.constant 10 : i32
    %39 = vector.broadcast %c10_i32 : i32 to vector<128x128xi32>
    %40 = arith.cmpi slt, %38, %39 : vector<128x128xi32>
    %cst_29 = arith.constant 0xFF800000 : f32
    %41 = vector.broadcast %cst_29 : f32 to vector<128x128xf32>
    %42 = arith.select %40, %37, %41 : vector<128x128xi1>, vector<128x128xf32>
    %cst_30 = arith.constant dense<0xFF800000> : vector<128xf32>
    %43 = vector.multi_reduction <maximumf>, %42, %cst_30 [1] : vector<128x128xf32> to vector<128xf32>
    %44 = vector.shape_cast %43 : vector<128xf32> to vector<128x1xf32>
    %45 = vector.broadcast %44 : vector<128x1xf32> to vector<128x128xf32>
    %46 = arith.subf %42, %45 : vector<128x128xf32>
    %47 = math.exp %46 : vector<128x128xf32>
    %cst_31 = arith.constant dense<0.000000e+00> : vector<128xf32>
    %48 = vector.multi_reduction <add>, %47, %cst_31 [1] : vector<128x128xf32> to vector<128xf32>
    %49 = vector.shape_cast %48 : vector<128xf32> to vector<128x1xf32>
    %50 = vector.broadcast %49 : vector<128x1xf32> to vector<128x128xf32>
    %51 = arith.divf %47, %50 : vector<128x128xf32>
    %c0_32 = arith.constant 0 : index
    %c0_33 = arith.constant 0 : index
    %52 = vector.load %arg12[%c0_32, %c0_33] : memref<128x128xf32, #tpu.memory_space<vmem>>, vector<128x128xf32>
    tpu.vector_store %arg12[%c0_32, %c0_33], %51 {strides = array<i32>} : memref<128x128xf32, #tpu.memory_space<vmem>>, vector<128x128xf32>,
    return
  }
  func.func @transform_0(%arg0: i32) -> (i32, i32) {
    %c0_i32 = arith.constant 0 : i32
    %c0_i32_0 = arith.constant 0 : i32
    return %arg0, %c0_i32 : i32, i32
  }
  func.func @transform_1(%arg0: i32) -> (i32, i32) {
    %c0_i32 = arith.constant 0 : i32
    %c0_i32_0 = arith.constant 0 : i32
    %c0_i32_1 = arith.constant 0 : i32
    return %c0_i32, %c0_i32_0 : i32, i32
  }
  func.func @transform_2(%arg0: i32) -> (i32, i32) {
    %c0_i32 = arith.constant 0 : i32
    %c0_i32_0 = arith.constant 0 : i32
    %c0_i32_1 = arith.constant 0 : i32
    return %c0_i32, %c0_i32_0 : i32, i32
  }
  func.func @transform_3(%arg0: i32) -> (i32, i32) {
    %c0_i32 = arith.constant 0 : i32
    %c0_i32_0 = arith.constant 0 : i32
    %c0_i32_1 = arith.constant 0 : i32
    return %c0_i32, %c0_i32_0 : i32, i32
  }
  func.func @transform_4(%arg0: i32) -> (i32, i32) {
    %c0_i32 = arith.constant 0 : i32
    %c0_i32_0 = arith.constant 0 : i32
    %c0_i32_1 = arith.constant 0 : i32
    return %c0_i32, %c0_i32_0 : i32, i32
  }
  func.func @transform_5(%arg0: i32) -> (i32, i32) {
    %c0_i32 = arith.constant 0 : i32
    %c0_i32_0 = arith.constant 0 : i32
    %c0_i32_1 = arith.constant 0 : i32
    return %c0_i32, %c0_i32_0 : i32, i32
  }
  func.func @transform_6(%arg0: i32) -> (i32, i32) {
    %c0_i32 = arith.constant 0 : i32
    %c0_i32_0 = arith.constant 0 : i32
    %c0_i32_1 = arith.constant 0 : i32
    return %c0_i32, %c0_i32_0 : i32, i32
  }
  func.func @transform_7(%arg0: i32) -> (i32, i32) {
    %c0_i32 = arith.constant 0 : i32
    %c0_i32_0 = arith.constant 0 : i32
    %c0_i32_1 = arith.constant 0 : i32
    return %c0_i32, %c0_i32_0 : i32, i32
  }
  func.func @transform_8(%arg0: i32) -> (i32, i32) {
    %c0_i32 = arith.constant 0 : i32
    %c0_i32_0 = arith.constant 0 : i32
    %c0_i32_1 = arith.constant 0 : i32
    return %c0_i32, %c0_i32_0 : i32, i32
  }
  func.func @transform_9(%arg0: i32) -> (i32, i32) {
    %c0_i32 = arith.constant 0 : i32
    %c0_i32_0 = arith.constant 0 : i32
    %c0_i32_1 = arith.constant 0 : i32
    return %c0_i32, %c0_i32_0 : i32, i32
  }
  func.func @transform_10(%arg0: i32) -> (i32, i32) {
    %c0_i32 = arith.constant 0 : i32
    %c0_i32_0 = arith.constant 0 : i32
    %c0_i32_1 = arith.constant 0 : i32
    return %c0_i32, %c0_i32_0 : i32, i32
  }
  func.func @transform_11(%arg0: i32) -> (i32, i32) {
    %c0_i32 = arith.constant 0 : i32
    %c0_i32_0 = arith.constant 0 : i32
    return %arg0, %c0_i32 : i32, i32
  }
}

</mosaic_0001>

<bundles_post_ra>
// kernel: tpu_custom_call.1
= control target key start
LH: loop header
LB: loop body
LE: loop exit
PB: predicated region body
PF: predicated region fallthrough
CT: control target
= control target key end

     0   :  { %16 = vsyncpa [#allocation3], 0  ;;  %s4603_s0 = inlined_call_operand.hbm [shape: bf16[128,896], index: 0, kind: input, shape index: {}]   ;;  %s4604_s1 = inlined_call_operand.hbm [shape: bf16[896,256], index: 1, kind: input, shape index: {}]   ;;  %s4605_s2 = inlined_call_operand.vmem [shape: f32[1,256], index: 2, kind: input, shape index: {}]   ;;  %s4606_s3 = inlined_call_operand.hbm [shape: bf16[256,256], index: 3, kind: input, shape index: {}]   ;;  %s4607_s4 = inlined_call_operand.vmem [shape: f32[1,256], index: 4, kind: input, shape index: {}]   ;;  %s4608_s5 = inlined_call_operand.hbm [shape: bf16[256,128], index: 5, kind: input, shape index: {}]   ;;  %s4609_s6 = inlined_call_operand.vmem [shape: f32[1,128], index: 6, kind: input, shape index: {}]   ;;  %s4610_s7 = inlined_call_operand.hbm [shape: bf16[128,128], index: 7, kind: input, shape index: {}]   ;;  %s4611_s8 = inlined_call_operand.vmem [shape: f32[1,128], index: 8, kind: input, shape index: {}]   ;;  %s4612_s9 = inlined_call_operand.hbm [shape: bf16[128,128], index: 9, kind: input, shape index: {}]   ;;  %s4613_s10 = inlined_call_operand.vmem [shape: f32[1,128], index: 10, kind: input, shape index: {}]   ;;  %s4614_s11 = inlined_call_operand.hbm [shape: f32[128,128], index: 11, kind: output, shape index: {}]  }
   0x1   :  { %17 = vsyncpa [#allocation6], 0 }
   0x2   :  { %18 = vsyncpa [#allocation9], 0 }
   0x3   :  { %19 = vsyncpa [#allocation12], 0 }
   0x4   :  { %20 = vsyncpa [#allocation4], 0  ;;  %s3963_s17 = smov [#allocation5]   ;;  %s3799_s21 = scalar_lea.hbm %s4604_s1, 14336 }
   0x5   :  { %s38_s18 = sshll.u32 %s3963_s17, 4  ;;  %p3800_p0 = scmp.ne.s32.totalorder %s4604_s1, %s3799_s21  ;;  %s39_s18 = int_to_ptr.vmem [resolvable:$true] %s38_s18 }
   0x6   :  { %p3803_p1 = scmp.lt.u32.totalorder %s3799_s21, %s4604_s1 }
   0x8   :  { %p3805_p2 = pnand %p3803_p1, %p3800_p0 }
   0xa   :  { %3808 = shalt.err (!%p3805_p2)
}
   0xb   :  { %s3809_s26 = scalar_lea.vmem %s39_s18, 14336  ;;  %p3814_p4 = scmp.lt.s32.totalorder %s39_s18, %s39_s18 }
   0xc   :  { %p3810_p3 = scmp.ne.s32.totalorder %s39_s18, %s3809_s26  ;;  %p3815_p5 = scmp.lt.s32.totalorder %s3809_s26, %s3809_s26 }
   0xe   :  { %p3816_p6 = por %p3815_p5, %p3814_p4 }
  0x10   :  { %p3817_p7 = pnand %p3816_p6, %p3810_p3 }
  0x12   :  { %3820 = shalt.err (!%p3817_p7)
}
  0x13   :  { %s3964_s27 = smov 128   ;;  %s3965_s28 = smov 8  }
  0x14   :  { %44 = dma.hbm_to_vmem [thread:$0]  %s4604_s1, 14336, %s39_s18, [#allocation6], %s3964_s27, %s3964_s27, %s3965_s28  }
  0x15   :  { %s3966_s12 = smov [#allocation8]   ;;  %s3821_s16 = scalar_lea.hbm %s4608_s5, 2048 }
  0x16   :  { %s66_s13 = sshll.u32 %s3966_s12, 4  ;;  %p3822_p8 = scmp.ne.s32.totalorder %s4608_s5, %s3821_s16  ;;  %s67_s13 = int_to_ptr.vmem [resolvable:$true] %s66_s13 }
  0x17   :  { %p3825_p9 = scmp.lt.u32.totalorder %s3821_s16, %s4608_s5 }
  0x19   :  { %p3827_p10 = pnand %p3825_p9, %p3822_p8 }
  0x1b   :  { %3830 = shalt.err (!%p3827_p10)
}
  0x1c   :  { %s3831_s22 = scalar_lea.vmem %s67_s13, 2048  ;;  %p3836_p12 = scmp.lt.s32.totalorder %s67_s13, %s67_s13 }
  0x1d   :  { %p3832_p11 = scmp.ne.s32.totalorder %s67_s13, %s3831_s22  ;;  %p3837_p13 = scmp.lt.s32.totalorder %s3831_s22, %s3831_s22 }
  0x1f   :  { %p3838_p0 = por %p3837_p13, %p3836_p12 }
  0x21   :  { %p3839_p1 = pnand %p3838_p0, %p3832_p11 }
  0x23   :  { %3842 = shalt.err (!%p3839_p1)
}
  0x24   :  { %s3967_s1 = smov 64   ;;  %s3968_s18 = smov 4  }
  0x25   :  { %72 = dma.hbm_to_vmem [thread:$0]  %s4608_s5, 2048, %s67_s13, [#allocation9], %s3967_s1, %s3967_s1, %s3968_s18  }
  0x26   :  { %s3969_s25 = smov [#allocation2]   ;;  %s3843_s12 = scalar_lea.hbm %s4603_s0, 7168 }
  0x27   :  { %s26_s26 = sshll.u32 %s3969_s25, 4  ;;  %p3844_p2 = scmp.ne.s32.totalorder %s4603_s0, %s3843_s12  ;;  %s27_s26 = int_to_ptr.vmem [resolvable:$true] %s26_s26 }
  0x28   :  { %p3847_p3 = scmp.lt.u32.totalorder %s3843_s12, %s4603_s0 }
  0x2a   :  { %p3849_p4 = pnand %p3847_p3, %p3844_p2 }
  0x2c   :  { %3852 = shalt.err (!%p3849_p4)
}
  0x2d   :  { %s3853_s19 = scalar_lea.vmem %s27_s26, 7168  ;;  %p3858_p6 = scmp.lt.s32.totalorder %s27_s26, %s27_s26 }
  0x2e   :  { %p3854_p5 = scmp.ne.s32.totalorder %s27_s26, %s3853_s19  ;;  %p3859_p7 = scmp.lt.s32.totalorder %s3853_s19, %s3853_s19 }
  0x30   :  { %p3860_p8 = por %p3859_p7, %p3858_p6 }
  0x32   :  { %p3861_p9 = pnand %p3860_p8, %p3854_p5 }
  0x34   :  { %3864 = shalt.err (!%p3861_p9)
}
  0x35   :  { %s3970_s5 = smov 448   ;;  %s3971_s13 = smov 28  }
  0x36   :  { %32 = dma.hbm_to_vmem [thread:$0]  %s4603_s0, 7168, %s27_s26, [#allocation3], %s3970_s5, %s3970_s5, %s3971_s13  }
  0x37   :  { %s3972_s22 = smov [#allocation7]   ;;  %s3973_s24 = smov [#allocation10]  }
  0x38   :  { %s52_s23 = sshll.u32 %s3972_s22, 4  ;;  %s80_s25 = sshll.u32 %s3973_s24, 4  ;;  %s53_s23 = int_to_ptr.vmem [resolvable:$true] %s52_s23  ;;  %s81_s25 = int_to_ptr.vmem [resolvable:$true] %s80_s25 }
  0x39   :  { %s3865_s12 = scalar_lea.hbm %s4606_s3, 4096 }
  0x3a   :  { %p3866_p10 = scmp.ne.s32.totalorder %s4606_s3, %s3865_s12  ;;  %p3869_p11 = scmp.lt.u32.totalorder %s3865_s12, %s4606_s3 }
  0x3c   :  { %p3871_p12 = pnand %p3869_p11, %p3866_p10 }
  0x3e   :  { %3874 = shalt.err (!%p3871_p12)
}
  0x3f   :  { %s3875_s0 = scalar_lea.vmem %s53_s23, 4096  ;;  %p3880_p0 = scmp.lt.s32.totalorder %s53_s23, %s53_s23 }
  0x40   :  { %p3876_p13 = scmp.ne.s32.totalorder %s53_s23, %s3875_s0  ;;  %p3881_p1 = scmp.lt.s32.totalorder %s3875_s0, %s3875_s0 }
  0x42   :  { %p3882_p2 = por %p3881_p1, %p3880_p0 }
  0x44   :  { %p3883_p3 = pnand %p3882_p2, %p3876_p13 }
  0x46   :  { %3886 = shalt.err (!%p3883_p3)
}
  0x47   :  { %58 = dma.hbm_to_vmem [thread:$0]  %s4606_s3, 4096, %s53_s23, [#allocation6], %s3964_s27, %s3964_s27, %s3965_s28  }
  0x48   :  { %s3887_s20 = scalar_lea.hbm %s4610_s7, 1024 }
  0x49   :  { %p3888_p4 = scmp.ne.s32.totalorder %s4610_s7, %s3887_s20  ;;  %p3891_p5 = scmp.lt.u32.totalorder %s3887_s20, %s4610_s7 }
  0x4b   :  { %p3893_p6 = pnand %p3891_p5, %p3888_p4 }
  0x4d   :  { %3896 = shalt.err (!%p3893_p6)
}
  0x4e   :  { %s3897_s30 = scalar_lea.vmem %s81_s25, 1024  ;;  %p3902_p8 = scmp.lt.s32.totalorder %s81_s25, %s81_s25 }
  0x4f   :  { %p3898_p7 = scmp.ne.s32.totalorder %s81_s25, %s3897_s30  ;;  %p3903_p9 = scmp.lt.s32.totalorder %s3897_s30, %s3897_s30 }
  0x51   :  { %p3904_p10 = por %p3903_p9, %p3902_p8 }
  0x53   :  { %p3905_p11 = pnand %p3904_p10, %p3898_p7 }
  0x55   :  { %3908 = shalt.err (!%p3905_p11)
}
  0x56   :  { %86 = dma.hbm_to_vmem [thread:$0]  %s4610_s7, 1024, %s81_s25, [#allocation9], %s3967_s1, %s3967_s1, %s3968_s18  }
  0x57   :  { %s3974_s12 = smov [#allocation11]   ;;  %s3909_s17 = scalar_lea.hbm %s4612_s9, 1024 }
  0x58   :  { %s94_s14 = sshll.u32 %s3974_s12, 4  ;;  %p3910_p12 = scmp.ne.s32.totalorder %s4612_s9, %s3909_s17  ;;  %s95_s14 = int_to_ptr.vmem [resolvable:$true] %s94_s14 }
  0x59   :  { %p3913_p13 = scmp.lt.u32.totalorder %s3909_s17, %s4612_s9 }
  0x5b   :  { %p3915_p0 = pnand %p3913_p13, %p3910_p12 }
  0x5d   :  { %3918 = shalt.err (!%p3915_p0)
}
  0x5e   :  { %s3919_s13 = scalar_lea.vmem %s95_s14, 1024  ;;  %p3924_p2 = scmp.lt.s32.totalorder %s95_s14, %s95_s14 }
  0x5f   :  { %p3920_p1 = scmp.ne.s32.totalorder %s95_s14, %s3919_s13  ;;  %p3925_p3 = scmp.lt.s32.totalorder %s3919_s13, %s3919_s13 }
  0x61   :  { %p3926_p4 = por %p3925_p3, %p3924_p2 }
  0x63   :  { %p3927_p5 = pnand %p3926_p4, %p3920_p1 }
  0x65   :  { %3930 = shalt.err (!%p3927_p5)
}
  0x66   :  { %100 = dma.hbm_to_vmem [thread:$0]  %s4612_s9, 1024, %s95_s14, [#allocation12], %s3967_s1, %s3967_s1, %s3968_s18  }
  0x67   :  { %3953 = dma.done.wait [#allocation3], 7168  }
  0x68   :  { %3954 = vsyncadd [#allocation3], 4294960128 }
  0x69   :  { %3955 = dma.done.wait [#allocation6], 18432  }
  0x6a   :  { %3956 = vsyncadd [#allocation6], 4294948864 }
  0x6b   :  { %3957 = dma.done.wait [#allocation9], 3072  }
  0x6c   :  { %3958 = vsyncadd [#allocation9], 4294964224 }
  0x6d   :  { %3959 = dma.done.wait [#allocation12], 1024  }
  0x6e   :  { %3960 = vsyncadd [#allocation12], 4294966272  ;;  %v3407_v0 = vld [vmem:[#allocation5 + $0x4] ss:$8 sps:$4 sm:$0xff]   ;;  %v3409_v1 = vld [vmem:[#allocation5] ss:$8 sps:$4 sm:$0xff]  }
  0x6f   :  { %1158 = vmatprep.subr.bf16.mxu0 %v3407_v0  ;;  %v3410_v2 = vld [vmem:[#allocation5 + $0x14] ss:$8 sps:$4 sm:$0xff]   ;;  %v3412_v3 = vld [vmem:[#allocation5 + $0x10] ss:$8 sps:$4 sm:$0xff]   ;;  %v3413_v4 = vld [vmem:[#allocation5 + $0x24] ss:$8 sps:$4 sm:$0xff]  }
  0x70   :  { %1159 = vmatpush1.bf16.msra.mxu0 %v3409_v1  ;;  %v3415_v5 = vld [vmem:[#allocation5 + $0x20] ss:$8 sps:$4 sm:$0xff]   ;;  %v3416_v6 = vld [vmem:[#allocation5 + $0x34] ss:$8 sps:$4 sm:$0xff]   ;;  %v3418_v7 = vld [vmem:[#allocation5 + $0x30] ss:$8 sps:$4 sm:$0xff]  }
  0x71   :  { %1160 = vmatprep.subr.bf16.mxu0 %v3410_v2  ;;  %v3419_v8 = vld [vmem:[#allocation5 + $0x44] ss:$8 sps:$4 sm:$0xff]   ;;  %v3421_v9 = vld [vmem:[#allocation5 + $0x40] ss:$8 sps:$4 sm:$0xff]   ;;  %v3422_v10 = vld [vmem:[#allocation5 + $0x54] ss:$8 sps:$4 sm:$0xff]  }
  0x72   :  { %v3424_v11 = vld [vmem:[#allocation5 + $0x50] ss:$8 sps:$4 sm:$0xff]   ;;  %v3425_v12 = vld [vmem:[#allocation5 + $0x64] ss:$8 sps:$4 sm:$0xff]   ;;  %v3427_v14 = vld [vmem:[#allocation5 + $0x60] ss:$8 sps:$4 sm:$0xff]  }
  0x73   :  { %v3457_v13 = vld [vmem:[#allocation2 + $0x4] ss:$28 sps:$4 sm:$0xff]   ;;  %v3428_v15 = vld [vmem:[#allocation5 + $0x74] ss:$8 sps:$4 sm:$0xff]   ;;  %v3430_v16 = vld [vmem:[#allocation5 + $0x70] ss:$8 sps:$4 sm:$0xff]  }
  0x74   :  { %1161 = vmatpush1.bf16.msra.mxu0 %v3412_v3  ;;  %1190 = vmatprep.mubr.bf16.mxu0 %v3457_v13  ;;  %v3431_v17 = vld [vmem:[#allocation5 + $0x84] ss:$8 sps:$4 sm:$0xff]   ;;  %v3433_v18 = vld [vmem:[#allocation5 + $0x80] ss:$8 sps:$4 sm:$0xff]   ;;  %v3434_v19 = vld [vmem:[#allocation5 + $0x94] ss:$8 sps:$4 sm:$0xff]  }
  0x75   :  { %1162 = vmatprep.subr.bf16.mxu0 %v3413_v4  ;;  %v3436_v20 = vld [vmem:[#allocation5 + $0x90] ss:$8 sps:$4 sm:$0xff]   ;;  %v3437_v21 = vld [vmem:[#allocation5 + $0xa4] ss:$8 sps:$4 sm:$0xff]   ;;  %v3439_v22 = vld [vmem:[#allocation5 + $0xa0] ss:$8 sps:$4 sm:$0xff]  }
  0x76   :  { %v3440_v23 = vld [vmem:[#allocation5 + $0xb4] ss:$8 sps:$4 sm:$0xff]   ;;  %v3442_v24 = vld [vmem:[#allocation5 + $0xb0] ss:$8 sps:$4 sm:$0xff]   ;;  %v3443_v25 = vld [vmem:[#allocation5 + $0xc4] ss:$8 sps:$4 sm:$0xff]  }
  0x77   :  { %v3445_v26 = vld [vmem:[#allocation5 + $0xc0] ss:$8 sps:$4 sm:$0xff]   ;;  %v3446_v27 = vld [vmem:[#allocation5 + $0xd4] ss:$8 sps:$4 sm:$0xff]   ;;  %v3448_v28 = vld [vmem:[#allocation5 + $0xd0] ss:$8 sps:$4 sm:$0xff]  }
  0x78   :  { %1163 = vmatpush1.bf16.msra.mxu0 %v3415_v5  ;;  %v3449_v29 = vld [vmem:[#allocation5 + $0xe4] ss:$8 sps:$4 sm:$0xff]   ;;  %v3451_v30 = vld [vmem:[#allocation5 + $0xe0] ss:$8 sps:$4 sm:$0xff]   ;;  %v3452_v31 = vld [vmem:[#allocation5 + $0xf4] ss:$8 sps:$4 sm:$0xff]  }
  0x79   :  { %1164 = vmatprep.subr.bf16.mxu0 %v3416_v6  ;;  %v3454_v32 = vld [vmem:[#allocation5 + $0xf0] ss:$8 sps:$4 sm:$0xff]   ;;  %v3460_v33 = vld [vmem:[#allocation5 + $0x104] ss:$8 sps:$4 sm:$0xff]   ;;  %v3455_v34 = vld [vmem:[#allocation2] ss:$28 sps:$4 sm:$0xff]  }
  0x7a   :  { %v3458_v35 = vld [vmem:[#allocation5 + $0x100] ss:$8 sps:$4 sm:$0xff]   ;;  %v3464_v36 = vld [vmem:[#allocation2 + $0x3c] ss:$28 sps:$4 sm:$0xff]   ;;  %v3975_v38 = vmov 0  }
  0x7b   :  { %v3463_v37 = vld [vmem:[#allocation5 + $0x114] ss:$8 sps:$4 sm:$0xff]   ;;  %1529 = vmatprep.mubr.bf16.mxu1 %v3975_v38  ;;  %v3461_v39 = vld [vmem:[#allocation5 + $0x110] ss:$8 sps:$4 sm:$0xff]   ;;  %v3469_v40 = vld [vmem:[#allocation5 + $0x124] ss:$8 sps:$4 sm:$0xff]  }
  0x7c   :  { %1165 = vmatpush1.bf16.msra.mxu0 %v3418_v7  ;;  %v3466_v41 = vld [vmem:[#allocation2 + $0x38] ss:$28 sps:$4 sm:$0xff]   ;;  %v3467_v42 = vld [vmem:[#allocation5 + $0x120] ss:$8 sps:$4 sm:$0xff]   ;;  %v3569_v45 = vld [vmem:[#allocation5 + $0x304] ss:$8 sps:$4 sm:$0xff]  }
  0x7d   :  { %1166 = vmatprep.subr.bf16.mxu0 %v3419_v8  ;;  %v3472_v43 = vld [vmem:[#allocation5 + $0x134] ss:$8 sps:$4 sm:$0xff]   ;;  %v3571_v46 = vld [vmem:[#allocation5 + $0x300] ss:$8 sps:$4 sm:$0xff]   ;;  %v3470_v47 = vld [vmem:[#allocation5 + $0x130] ss:$8 sps:$4 sm:$0xff]   ;;  %1497 = vmatprep.subr.bf16.mxu1 %v3569_v45 }
  0x7e   :  { %v3473_v44 = vld [vmem:[#allocation2 + $0x74] ss:$28 sps:$4 sm:$0xff]   ;;  %v3478_v48 = vld [vmem:[#allocation5 + $0x144] ss:$8 sps:$4 sm:$0xff]   ;;  %1498 = vmatpush1.bf16.msra.mxu1 %v3571_v46  ;;  %v3476_v52 = vld [vmem:[#allocation5 + $0x140] ss:$8 sps:$4 sm:$0xff]  }
  0x7f   :  { %v3575_v49 = vld [vmem:[#allocation5 + $0x314] ss:$8 sps:$4 sm:$0xff]   ;;  %v3577_v50 = vld [vmem:[#allocation5 + $0x310] ss:$8 sps:$4 sm:$0xff]   ;;  %v3482_v54 = vld [vmem:[#allocation2 + $0xac] ss:$28 sps:$4 sm:$0xff]  }
  0x80   :  { %1167 = vmatpush1.bf16.msra.mxu0 %v3421_v9  ;;  %v3475_v51 = vld [vmem:[#allocation2 + $0x70] ss:$28 sps:$4 sm:$0xff]   ;;  %1499 = vmatprep.subr.bf16.mxu1 %v3575_v49  ;;  %v3481_v53 = vld [vmem:[#allocation5 + $0x154] ss:$8 sps:$4 sm:$0xff]   ;;  %v3586_v56 = vld [vmem:[#allocation5 + $0x320] ss:$8 sps:$4 sm:$0xff]  }
  0x81   :  { %1168 = vmatprep.subr.bf16.mxu0 %v3422_v10  ;;  %v3584_v55 = vld [vmem:[#allocation5 + $0x324] ss:$8 sps:$4 sm:$0xff]   ;;  %v3590_v57 = vld [vmem:[#allocation5 + $0x334] ss:$8 sps:$4 sm:$0xff]   ;;  %v3479_v58 = vld [vmem:[#allocation5 + $0x150] ss:$8 sps:$4 sm:$0xff]  }
  0x82   :  { %1500 = vmatpush1.bf16.msra.mxu1 %v3577_v50  ;;  %v3487_v59 = vld [vmem:[#allocation5 + $0x164] ss:$8 sps:$4 sm:$0xff]   ;;  %v3592_v60 = vld [vmem:[#allocation5 + $0x330] ss:$8 sps:$4 sm:$0xff]   ;;  %v3485_v62 = vld [vmem:[#allocation5 + $0x160] ss:$8 sps:$4 sm:$0xff]  }
  0x83   :  { %1501 = vmatprep.subr.bf16.mxu1 %v3584_v55  ;;  %v3484_v61 = vld [vmem:[#allocation2 + $0xa8] ss:$28 sps:$4 sm:$0xff]   ;;  %v3490_v0 = vld [vmem:[#allocation5 + $0x174] ss:$8 sps:$4 sm:$0xff]   ;;  %v3488_v4 = vld [vmem:[#allocation5 + $0x170] ss:$8 sps:$4 sm:$0xff]  }
  0x84   :  { %1169 = vmatpush1.bf16.msra.mxu0 %v3424_v11  ;;  %v3599_v63 = vld [vmem:[#allocation5 + $0x344] ss:$8 sps:$4 sm:$0xff]   ;;  %v3601_v2 = vld [vmem:[#allocation5 + $0x340] ss:$8 sps:$4 sm:$0xff]   ;;  %v3605_v3 = vld [vmem:[#allocation5 + $0x354] ss:$8 sps:$4 sm:$0xff]  }
  0x85   :  { %1170 = vmatprep.subr.bf16.mxu0 %v3425_v12  ;;  %v3491_v1 = vld [vmem:[#allocation2 + $0xe4] ss:$28 sps:$4 sm:$0xff]   ;;  %v3607_v6 = vld [vmem:[#allocation5 + $0x350] ss:$8 sps:$4 sm:$0xff]   ;;  %v3499_v10 = vld [vmem:[#allocation5 + $0x194] ss:$8 sps:$4 sm:$0xff]  }
  0x86   :  { %1502 = vmatpush1.bf16.msra.mxu1 %v3586_v56  ;;  %v3496_v5 = vld [vmem:[#allocation5 + $0x184] ss:$8 sps:$4 sm:$0xff]   ;;  %v3493_v8 = vld [vmem:[#allocation2 + $0xe0] ss:$28 sps:$4 sm:$0xff]  }
  0x87   :  { %1503 = vmatprep.subr.bf16.mxu1 %v3590_v57  ;;  %v3614_v7 = vld [vmem:[#allocation5 + $0x364] ss:$8 sps:$4 sm:$0xff]   ;;  %v3494_v9 = vld [vmem:[#allocation5 + $0x180] ss:$8 sps:$4 sm:$0xff]   ;;  %v3500_v11 = vld [vmem:[#allocation2 + $0x11c] ss:$28 sps:$4 sm:$0xff]  }
  0x88   :  { %1171 = vmatpush1.bf16.msra.mxu0 %v3427_v14  ;;  %v3616_v12 = vld [vmem:[#allocation5 + $0x360] ss:$8 sps:$4 sm:$0xff]   ;;  %v3620_v13 = vld [vmem:[#allocation5 + $0x374] ss:$8 sps:$4 sm:$0xff]   ;;  %v3497_v14 = vld [vmem:[#allocation5 + $0x190] ss:$8 sps:$4 sm:$0xff]  }
  0x89   :  { %1172 = vmatprep.subr.bf16.mxu0 %v3428_v15  ;;  %v3505_v15 = vld [vmem:[#allocation5 + $0x1a4] ss:$8 sps:$4 sm:$0xff]   ;;  %v3535_v45 = vld [vmem:[#allocation5 + $0x214] ss:$8 sps:$4 sm:$0xff]   ;;  %v4140_v50 = vld [vmem:[#allocation7 + $0x20] ss:$8 sps:$4 sm:$0xff]  }
  0x8a   :  { %1504 = vmatpush1.bf16.msra.mxu1 %v3592_v60  ;;  %v3638_v46 = vld [vmem:[#allocation2 + $0xc0] ss:$28 sps:$4 sm:$0xff]   ;;  %v3541_v49 = vld [vmem:[#allocation5 + $0x224] ss:$8 sps:$4 sm:$0xff]   ;;  %v3642_v57 = vld [vmem:[#allocation2 + $0xf8] ss:$28 sps:$4 sm:$0xff]  }
  0x8b   :  { %1505 = vmatprep.subr.bf16.mxu1 %v3599_v63  ;;  %v3545_v55 = vld [vmem:[#allocation2 + $0x7c] ss:$28 sps:$4 sm:$0xff]   ;;  %v4152_v60 = vld [vmem:[#allocation7 + $0x44] ss:$8 sps:$4 sm:$0xff]  }
  0x8c   :  { %1173 = vmatpush1.bf16.msra.mxu0 %v3430_v16  ;;  %v3622_v16 = vld [vmem:[#allocation5 + $0x370] ss:$8 sps:$4 sm:$0xff]   ;;  %v3544_v56 = vld [vmem:[#allocation5 + $0x234] ss:$8 sps:$4 sm:$0xff]  }
  0x8d   :  { %1174 = vmatprep.subr.bf16.mxu0 %v3431_v17  ;;  %v3502_v17 = vld [vmem:[#allocation2 + $0x118] ss:$28 sps:$4 sm:$0xff]  }
  0x8e   :  { %1506 = vmatpush1.bf16.msra.mxu1 %v3601_v2  ;;  %v4157_v63 = vld [vmem:[#allocation7 + $0x54] ss:$8 sps:$4 sm:$0xff]  }
  0x8f   :  { %1507 = vmatprep.subr.bf16.mxu1 %v3605_v3  ;;  %v3554_v2 = vld [vmem:[#allocation2 + $0xb4] ss:$28 sps:$4 sm:$0xff]  }
  0x90   :  { %1175 = vmatpush1.bf16.msra.mxu0 %v3433_v18  ;;  %v3503_v18 = vld [vmem:[#allocation5 + $0x1a0] ss:$8 sps:$4 sm:$0xff]   ;;  %v3553_v3 = vld [vmem:[#allocation5 + $0x254] ss:$8 sps:$4 sm:$0xff]  }
  0x91   :  { %1176 = vmatprep.subr.bf16.mxu0 %v3434_v19  ;;  %v3508_v19 = vld [vmem:[#allocation5 + $0x1b4] ss:$8 sps:$4 sm:$0xff]  }
  0x92   :  { %1508 = vmatpush1.bf16.msra.mxu1 %v3607_v6  ;;  %v3551_v6 = vld [vmem:[#allocation5 + $0x250] ss:$8 sps:$4 sm:$0xff]  }
  0x93   :  { %1509 = vmatprep.subr.bf16.mxu1 %v3614_v7  ;;  %v4165_v7 = vld [vmem:[#allocation7 + $0x64] ss:$8 sps:$4 sm:$0xff]  }
  0x94   :  { %1177 = vmatpush1.bf16.msra.mxu0 %v3436_v20  ;;  %v3509_v20 = vld [vmem:[#allocation2 + $0x154] ss:$28 sps:$4 sm:$0xff]  }
  0x95   :  { %1178 = vmatprep.subr.bf16.mxu0 %v3437_v21  ;;  %v3626_v21 = vld [vmem:[#allocation2 + $0x18] ss:$28 sps:$4 sm:$0xff]  }
  0x96   :  { %1510 = vmatpush1.bf16.msra.mxu1 %v3616_v12  ;;  %v3557_v12 = vld [vmem:[#allocation5 + $0x260] ss:$8 sps:$4 sm:$0xff]  }
  0x97   :  { %1511 = vmatprep.subr.bf16.mxu1 %v3620_v13  ;;  %v3563_v13 = vld [vmem:[#allocation2 + $0xec] ss:$28 sps:$4 sm:$0xff]  }
  0x98   :  { %1179 = vmatpush1.bf16.msra.mxu0 %v3439_v22  ;;  %v3506_v22 = vld [vmem:[#allocation5 + $0x1b0] ss:$8 sps:$4 sm:$0xff]  }
  0x99   :  { %1180 = vmatprep.subr.bf16.mxu0 %v3440_v23  ;;  %v3511_v23 = vld [vmem:[#allocation2 + $0x150] ss:$28 sps:$4 sm:$0xff]  }
  0x9a   :  { %1512 = vmatpush1.bf16.msra.mxu1 %v3622_v16  ;;  %v4174_v16 = vld [vmem:[#allocation7 + $0x70] ss:$8 sps:$4 sm:$0xff]  }
  0x9c   :  { %1181 = vmatpush1.bf16.msra.mxu0 %v3442_v24  ;;  %v3514_v24 = vld [vmem:[#allocation5 + $0x1c4] ss:$8 sps:$4 sm:$0xff]  }
  0x9d   :  { %1182 = vmatprep.subr.bf16.mxu0 %v3443_v25  ;;  %1530 = vmatmul.mubr.bf16.vlgmr.msra.gmra.mrb[0].mxu1 %v3626_v21  ;;  %v3512_v25 = vld [vmem:[#allocation5 + $0x1c0] ss:$8 sps:$4 sm:$0xff]   ;;  %v4184_v21 = vld [vmem:[#allocation7 + $0x94] ss:$8 sps:$4 sm:$0xff]  }
  0x9e   :  { %1539 = vmatprep.mubr.bf16.mxu1 %v3975_v38 }
  0xa0   :  { %1183 = vmatpush1.bf16.msra.mxu0 %v3445_v26  ;;  %v3517_v26 = vld [vmem:[#allocation5 + $0x1d4] ss:$8 sps:$4 sm:$0xff]  }
  0xa1   :  { %1184 = vmatprep.subr.bf16.mxu0 %v3446_v27  ;;  %v3518_v27 = vld [vmem:[#allocation2 + $0x18c] ss:$28 sps:$4 sm:$0xff]  }
  0xa4   :  { %1185 = vmatpush1.bf16.msra.mxu0 %v3448_v28  ;;  %v3630_v28 = vld [vmem:[#allocation2 + $0x50] ss:$28 sps:$4 sm:$0xff]  }
  0xa5   :  { %1186 = vmatprep.subr.bf16.mxu0 %v3449_v29  ;;  %v3515_v29 = vld [vmem:[#allocation5 + $0x1d0] ss:$8 sps:$4 sm:$0xff]   ;;  %1540 = vmatmul.mubr.bf16.gmra.mrb[4].mxu1 %v3630_v28  ;;  %v4192_v28 = vld [vmem:[#allocation7 + $0xa4] ss:$8 sps:$4 sm:$0xff]  }
  0xa6   :  { %1549 = vmatprep.mubr.bf16.mxu1 %v3975_v38 }
  0xa8   :  { %1187 = vmatpush1.bf16.msra.mxu0 %v3451_v30  ;;  %v3523_v30 = vld [vmem:[#allocation5 + $0x1e4] ss:$8 sps:$4 sm:$0xff]  }
  0xa9   :  { %1188 = vmatprep.subr.bf16.mxu0 %v3452_v31  ;;  %v3520_v31 = vld [vmem:[#allocation2 + $0x188] ss:$28 sps:$4 sm:$0xff]  }
  0xac   :  { %1189 = vmatpush1.bf16.msra.mxu0 %v3454_v32  ;;  %v3521_v32 = vld [vmem:[#allocation5 + $0x1e0] ss:$8 sps:$4 sm:$0xff]  }
  0xad   :  { %1271 = vmatprep.subr.bf16.mxu0 %v3460_v33  ;;  %v3529_v33 = vld [vmem:[#allocation2 + $0xc] ss:$28 sps:$4 sm:$0xff]  }
  0xaf   :  { %1191 = vmatmul.mubr.bf16.vlgmr.msra.gmra.mrb[0].mxu0 %v3455_v34  ;;  %v3526_v34 = vld [vmem:[#allocation5 + $0x1f4] ss:$8 sps:$4 sm:$0xff]  }
  0xb0   :  { %1272 = vmatpush1.bf16.msra.mxu0 %v3458_v35  ;;  %1200 = vmatprep.mubr.bf16.mxu0 %v3464_v36  ;;  %v3634_v35 = vld [vmem:[#allocation2 + $0x88] ss:$28 sps:$4 sm:$0xff]   ;;  %v3524_v36 = vld [vmem:[#allocation5 + $0x1f0] ss:$8 sps:$4 sm:$0xff]  }
  0xb1   :  { %1273 = vmatprep.subr.bf16.mxu0 %v3463_v37  ;;  %v4127_v37 = vld [vmem:[#allocation7 + $0x4] ss:$8 sps:$4 sm:$0xff]   ;;  %1550 = vmatmul.mubr.bf16.gmra.mrb[8].mxu1 %v3634_v35  ;;  %v3589_v35 = vld [vmem:[#allocation5 + $0x2b4] ss:$8 sps:$4 sm:$0xff]  }
  0xb2   :  { %1559 = vmatprep.mubr.bf16.mxu1 %v3975_v38  ;;  %3233 = vmatprep.subr.bf16.mxu1 %v4127_v37 }
  0xb4   :  { %1274 = vmatpush1.bf16.msra.mxu0 %v3461_v39  ;;  %v3532_v39 = vld [vmem:[#allocation5 + $0x204] ss:$8 sps:$4 sm:$0xff]  }
  0xb5   :  { %1275 = vmatprep.subr.bf16.mxu0 %v3469_v40  ;;  %v4129_v40 = vld [vmem:[#allocation7] ss:$8 sps:$4 sm:$0xff]  }
  0xb6   :  { %3249 = vmatpush1.bf16.msra.mxu1 %v4129_v40 }
  0xb7   :  { %1201 = vmatmul.mubr.bf16.gmra.mrb[4].mxu0 %v3466_v41  ;;  %v4132_v41 = vld [vmem:[#allocation7 + $0x14] ss:$8 sps:$4 sm:$0xff]  }
  0xb8   :  { %1276 = vmatpush1.bf16.msra.mxu0 %v3467_v42  ;;  %1210 = vmatprep.mubr.bf16.mxu0 %v3473_v44  ;;  %v3527_v42 = vld [vmem:[#allocation2 + $0x8] ss:$28 sps:$4 sm:$0xff]  }
  0xb9   :  { %1277 = vmatprep.subr.bf16.mxu0 %v3472_v43  ;;  %v3530_v43 = vld [vmem:[#allocation5 + $0x200] ss:$8 sps:$4 sm:$0xff]   ;;  %3234 = vmatprep.subr.bf16.mxu1 %v4132_v41 }
  0xba   :  { %v3536_v44 = vld [vmem:[#allocation2 + $0x44] ss:$28 sps:$4 sm:$0xff]   ;;  %1560 = vmatmul.mubr.bf16.gmra.mrb[12].mxu1 %v3638_v46 }
  0xbb   :  { %1569 = vmatprep.mubr.bf16.mxu1 %v3975_v38  ;;  %v3596_v46 = vld [vmem:[#allocation5 + $0x2c0] ss:$8 sps:$4 sm:$0xff]  }
  0xbc   :  { %1278 = vmatpush1.bf16.msra.mxu0 %v3470_v47  ;;  %v4137_v47 = vld [vmem:[#allocation7 + $0x10] ss:$8 sps:$4 sm:$0xff]  }
  0xbd   :  { %1279 = vmatprep.subr.bf16.mxu0 %v3478_v48  ;;  %v3533_v48 = vld [vmem:[#allocation5 + $0x210] ss:$8 sps:$4 sm:$0xff]   ;;  %3250 = vmatpush1.bf16.msra.mxu1 %v4137_v47 }
  0xbf   :  { %1211 = vmatmul.mubr.bf16.gmra.mrb[8].mxu0 %v3475_v51  ;;  %v4142_v51 = vld [vmem:[#allocation7 + $0x24] ss:$8 sps:$4 sm:$0xff]  }
  0xc0   :  { %1280 = vmatpush1.bf16.msra.mxu0 %v3476_v52  ;;  %1220 = vmatprep.mubr.bf16.mxu0 %v3482_v54  ;;  %v3538_v52 = vld [vmem:[#allocation2 + $0x40] ss:$28 sps:$4 sm:$0xff]  }
  0xc1   :  { %1281 = vmatprep.subr.bf16.mxu0 %v3481_v53  ;;  %v4144_v53 = vld [vmem:[#allocation7 + $0x34] ss:$8 sps:$4 sm:$0xff]   ;;  %v3539_v54 = vld [vmem:[#allocation5 + $0x220] ss:$8 sps:$4 sm:$0xff]   ;;  %3235 = vmatprep.subr.bf16.mxu1 %v4142_v51 }
  0xc2   :  { %3251 = vmatpush1.bf16.msra.mxu1 %v4140_v50 }
  0xc3   :  { %3236 = vmatprep.subr.bf16.mxu1 %v4144_v53  ;;  %1570 = vmatmul.mubr.bf16.gmra.mrb[16].mxu1 %v3642_v57  ;;  %v3625_v57 = vld [vmem:[#allocation2 + $0x14] ss:$28 sps:$4 sm:$0xff]  }
  0xc4   :  { %1282 = vmatpush1.bf16.msra.mxu0 %v3479_v58  ;;  %v4148_v58 = vld [vmem:[#allocation7 + $0x30] ss:$8 sps:$4 sm:$0xff]   ;;  %1579 = vmatprep.mubr.bf16.mxu1 %v3975_v38 }
  0xc5   :  { %1283 = vmatprep.subr.bf16.mxu0 %v3487_v59  ;;  %v3542_v59 = vld [vmem:[#allocation5 + $0x230] ss:$8 sps:$4 sm:$0xff]  }
  0xc6   :  { %3252 = vmatpush1.bf16.msra.mxu1 %v4148_v58 }
  0xc7   :  { %1221 = vmatmul.mubr.bf16.gmra.mrb[12].mxu0 %v3484_v61  ;;  %v3550_v61 = vld [vmem:[#allocation5 + $0x244] ss:$8 sps:$4 sm:$0xff]   ;;  %3237 = vmatprep.subr.bf16.mxu1 %v4152_v60 }
  0xc8   :  { %1284 = vmatpush1.bf16.msra.mxu0 %v3485_v62  ;;  %1230 = vmatprep.mubr.bf16.mxu0 %v3491_v1  ;;  %v4154_v62 = vld [vmem:[#allocation7 + $0x40] ss:$8 sps:$4 sm:$0xff]  }
  0xc9   :  { %1285 = vmatprep.subr.bf16.mxu0 %v3490_v0  ;;  %v3547_v0 = vld [vmem:[#allocation2 + $0x78] ss:$28 sps:$4 sm:$0xff]   ;;  %v3548_v1 = vld [vmem:[#allocation5 + $0x240] ss:$8 sps:$4 sm:$0xff]  }
  0xca   :  { %3253 = vmatpush1.bf16.msra.mxu1 %v4154_v62 }
  0xcb   :  { %3238 = vmatprep.subr.bf16.mxu1 %v4157_v63 }
  0xcc   :  { %1286 = vmatpush1.bf16.msra.mxu0 %v3488_v4  ;;  %v3646_v4 = vld [vmem:[#allocation2 + $0x130] ss:$28 sps:$4 sm:$0xff]  }
  0xcd   :  { %1287 = vmatprep.subr.bf16.mxu0 %v3496_v5  ;;  %v4161_v5 = vld [vmem:[#allocation7 + $0x50] ss:$8 sps:$4 sm:$0xff]   ;;  %1580 = vmatmul.mubr.bf16.gmra.mrb[20].mxu1 %v3646_v4  ;;  %v3633_v4 = vld [vmem:[#allocation2 + $0x80] ss:$28 sps:$4 sm:$0xff]  }
  0xce   :  { %3254 = vmatpush1.bf16.msra.mxu1 %v4161_v5  ;;  %1589 = vmatprep.mubr.bf16.mxu1 %v3975_v38 }
  0xcf   :  { %1231 = vmatmul.mubr.bf16.gmra.mrb[16].mxu0 %v3493_v8  ;;  %v3559_v8 = vld [vmem:[#allocation5 + $0x264] ss:$8 sps:$4 sm:$0xff]   ;;  %3239 = vmatprep.subr.bf16.mxu1 %v4165_v7 }
  0xd0   :  { %1288 = vmatpush1.bf16.msra.mxu0 %v3494_v9  ;;  %1240 = vmatprep.mubr.bf16.mxu0 %v3500_v11  ;;  %v4167_v9 = vld [vmem:[#allocation7 + $0x60] ss:$8 sps:$4 sm:$0xff]   ;;  %v3556_v11 = vld [vmem:[#allocation2 + $0xb0] ss:$28 sps:$4 sm:$0xff]  }
  0xd1   :  { %1289 = vmatprep.subr.bf16.mxu0 %v3499_v10  ;;  %v4170_v10 = vld [vmem:[#allocation7 + $0x74] ss:$8 sps:$4 sm:$0xff]  }
  0xd2   :  { %3255 = vmatpush1.bf16.msra.mxu1 %v4167_v9 }
  0xd3   :  { %3240 = vmatprep.subr.bf16.mxu1 %v4170_v10 }
  0xd4   :  { %1290 = vmatpush1.bf16.msra.mxu0 %v3497_v14  ;;  %v3562_v14 = vld [vmem:[#allocation5 + $0x274] ss:$8 sps:$4 sm:$0xff]  }
  0xd5   :  { %1291 = vmatprep.subr.bf16.mxu0 %v3505_v15  ;;  %v3650_v15 = vld [vmem:[#allocation2 + $0x168] ss:$28 sps:$4 sm:$0xff]  }
  0xd6   :  { %3256 = vmatpush1.bf16.msra.mxu1 %v4174_v16 }
  0xd7   :  { %1241 = vmatmul.mubr.bf16.gmra.mrb[20].mxu0 %v3502_v17  ;;  %v3560_v17 = vld [vmem:[#allocation5 + $0x270] ss:$8 sps:$4 sm:$0xff]   ;;  %1590 = vmatmul.mubr.bf16.gmra.mrb[24].mxu1 %v3650_v15 }
  0xd8   :  { %1292 = vmatpush1.bf16.msra.mxu0 %v3503_v18  ;;  %1250 = vmatprep.mubr.bf16.mxu0 %v3509_v20  ;;  %v4179_v18 = vld [vmem:[#allocation7 + $0x84] ss:$8 sps:$4 sm:$0xff]   ;;  %v4181_v20 = vld [vmem:[#allocation7 + $0x80] ss:$8 sps:$4 sm:$0xff]  }
  0xd9   :  { %1293 = vmatprep.subr.bf16.mxu0 %v3508_v19  ;;  %v3568_v19 = vld [vmem:[#allocation5 + $0x284] ss:$8 sps:$4 sm:$0xff]   ;;  %1599 = vmatprep.mubr.bf16.mxu1 %v3975_v38  ;;  %v3572_v38 = vld [vmem:[#allocation5 + $0x290] ss:$8 sps:$4 sm:$0xff]  }
  0xda   :  { %3241 = vmatprep.subr.bf16.mxu1 %v4179_v18 }
  0xdb   :  { %3257 = vmatpush1.bf16.msra.mxu1 %v4181_v20 }
  0xdc   :  { %1294 = vmatpush1.bf16.msra.mxu0 %v3506_v22  ;;  %v3565_v22 = vld [vmem:[#allocation2 + $0xe8] ss:$28 sps:$4 sm:$0xff]   ;;  %3242 = vmatprep.subr.bf16.mxu1 %v4184_v21 }
  0xdd   :  { %1295 = vmatprep.subr.bf16.mxu0 %v3514_v24  ;;  %v3578_v24 = vld [vmem:[#allocation2 + $0x124] ss:$28 sps:$4 sm:$0xff]  }
  0xdf   :  { %1251 = vmatmul.mubr.bf16.gmra.mrb[24].mxu0 %v3511_v23  ;;  %v3566_v23 = vld [vmem:[#allocation5 + $0x280] ss:$8 sps:$4 sm:$0xff]  }
  0xe0   :  { %1296 = vmatpush1.bf16.msra.mxu0 %v3512_v25  ;;  %1260 = vmatprep.mubr.bf16.mxu0 %v3518_v27  ;;  %v3574_v25 = vld [vmem:[#allocation5 + $0x294] ss:$8 sps:$4 sm:$0xff]   ;;  %v4189_v27 = vld [vmem:[#allocation7 + $0x90] ss:$8 sps:$4 sm:$0xff]  }
  0xe1   :  { %1297 = vmatprep.subr.bf16.mxu0 %v3517_v26  ;;  %v3654_v26 = vld [vmem:[#allocation2 + $0x1a0] ss:$28 sps:$4 sm:$0xff]   ;;  %3258 = vmatpush1.bf16.msra.mxu1 %v4189_v27 }
  0xe2   :  { %1600 = vmatmul.mubr.bf16.gmra.mrb[28].mxu1 %v3654_v26  ;;  %3243 = vmatprep.subr.bf16.mxu1 %v4192_v28  ;;  %v3703_v26 = vld [vmem:[#allocation8 + $0x40] sm:$0xff]  }
  0xe4   :  { %1298 = vmatpush1.bf16.msra.mxu0 %v3515_v29  ;;  %v3583_v29 = vld [vmem:[#allocation5 + $0x2a4] ss:$8 sps:$4 sm:$0xff]  }
  0xe5   :  { %1299 = vmatprep.subr.bf16.mxu0 %v3523_v30  ;;  %v4194_v30 = vld [vmem:[#allocation7 + $0xa0] ss:$8 sps:$4 sm:$0xff]  }
  0xe6   :  { %3259 = vmatpush1.bf16.msra.mxu1 %v4194_v30 }
  0xe7   :  { %1261 = vmatmul.mubr.bf16.gmra.mrb[28].mxu0 %v3520_v31  ;;  %v4196_v31 = vld [vmem:[#allocation7 + $0xb4] ss:$8 sps:$4 sm:$0xff]  }
  0xe8   :  { %1300 = vmatpush1.bf16.msra.mxu0 %v3521_v32  ;;  %1303 = vmatprep.mubr.bf16.mxu0 %v3529_v33  ;;  %v3580_v32 = vld [vmem:[#allocation2 + $0x120] ss:$28 sps:$4 sm:$0xff]  }
  0xe9   :  { %1301 = vmatprep.subr.bf16.mxu0 %v3526_v34  ;;  %v3581_v33 = vld [vmem:[#allocation5 + $0x2a0] ss:$8 sps:$4 sm:$0xff]   ;;  %v3593_v34 = vld [vmem:[#allocation2 + $0x15c] ss:$28 sps:$4 sm:$0xff]   ;;  %3244 = vmatprep.subr.bf16.mxu1 %v4196_v31 }
  0xec   :  { %1302 = vmatpush1.bf16.msra.mxu0 %v3524_v36  ;;  %v4201_v36 = vld [vmem:[#allocation7 + $0xb0] ss:$8 sps:$4 sm:$0xff]  }
  0xed   :  { %1384 = vmatprep.subr.bf16.mxu0 %v3532_v39  ;;  %v4203_v39 = vld [vmem:[#allocation7 + $0xc4] ss:$8 sps:$4 sm:$0xff]   ;;  %3260 = vmatpush1.bf16.msra.mxu1 %v4201_v36 }
  0xee   :  { %3245 = vmatprep.subr.bf16.mxu1 %v4203_v39 }
  0xef   :  { %1304 = vmatmul.mubr.bf16.vlgmr.msra.gmra.mrb[0].mxu0 %v3527_v42  ;;  %v3587_v42 = vld [vmem:[#allocation5 + $0x2b0] ss:$8 sps:$4 sm:$0xff]  }
  0xf0   :  { %1385 = vmatpush1.bf16.msra.mxu0 %v3530_v43  ;;  %1313 = vmatprep.mubr.bf16.mxu0 %v3536_v44  ;;  %v3598_v43 = vld [vmem:[#allocation5 + $0x2c4] ss:$8 sps:$4 sm:$0xff]   ;;  %v4206_v44 = vld [vmem:[#allocation7 + $0xc0] ss:$8 sps:$4 sm:$0xff]  }
  0xf1   :  { %1386 = vmatprep.subr.bf16.mxu0 %v3535_v45  ;;  %v3595_v45 = vld [vmem:[#allocation2 + $0x158] ss:$28 sps:$4 sm:$0xff]   ;;  %3261 = vmatpush1.bf16.msra.mxu1 %v4206_v44 }
  0xf4   :  { %1387 = vmatpush1.bf16.msra.mxu0 %v3533_v48  ;;  %v3608_v48 = vld [vmem:[#allocation2 + $0x194] ss:$28 sps:$4 sm:$0xff]  }
  0xf5   :  { %1388 = vmatprep.subr.bf16.mxu0 %v3541_v49  ;;  %v3604_v49 = vld [vmem:[#allocation5 + $0x2d4] ss:$8 sps:$4 sm:$0xff]  }
  0xf7   :  { %1314 = vmatmul.mubr.bf16.gmra.mrb[4].mxu0 %v3538_v52  ;;  %v3602_v52 = vld [vmem:[#allocation5 + $0x2d0] ss:$8 sps:$4 sm:$0xff]  }
  0xf8   :  { %1389 = vmatpush1.bf16.msra.mxu0 %v3539_v54  ;;  %1323 = vmatprep.mubr.bf16.mxu0 %v3545_v55  ;;  %v3613_v54 = vld [vmem:[#allocation5 + $0x2e4] ss:$8 sps:$4 sm:$0xff]  }
  0xf9   :  { %1390 = vmatprep.subr.bf16.mxu0 %v3544_v56  ;;  %v3610_v55 = vld [vmem:[#allocation2 + $0x190] ss:$28 sps:$4 sm:$0xff]   ;;  %v3611_v56 = vld [vmem:[#allocation5 + $0x2e0] ss:$8 sps:$4 sm:$0xff]  }
  0xfc   :  { %1391 = vmatpush1.bf16.msra.mxu0 %v3542_v59  ;;  %v3619_v59 = vld [vmem:[#allocation5 + $0x2f4] ss:$8 sps:$4 sm:$0xff]  }
  0xfd   :  { %1392 = vmatprep.subr.bf16.mxu0 %v3550_v61  ;;  %v3617_v61 = vld [vmem:[#allocation5 + $0x2f0] ss:$8 sps:$4 sm:$0xff]  }
  0xff   :  { %1324 = vmatmul.mubr.bf16.gmra.mrb[8].mxu0 %v3547_v0  ;;  %v3623_v0 = vld [vmem:[#allocation2 + $0x10] ss:$28 sps:$4 sm:$0xff]  }
 0x100   :  { %1393 = vmatpush1.bf16.msra.mxu0 %v3548_v1  ;;  %1333 = vmatprep.mubr.bf16.mxu0 %v3554_v2  ;;  %v3627_v1 = vld [vmem:[#allocation2 + $0x4c] ss:$28 sps:$4 sm:$0xff]  }
 0x101   :  { %1394 = vmatprep.subr.bf16.mxu0 %v3553_v3  ;;  %v3629_v2 = vld [vmem:[#allocation2 + $0x48] ss:$28 sps:$4 sm:$0xff]  }
 0x102   :  { %v3631_v3 = vld [vmem:[#allocation2 + $0x84] ss:$28 sps:$4 sm:$0xff]  }
 0x104   :  { %1395 = vmatpush1.bf16.msra.mxu0 %v3551_v6  ;;  %v3699_v6 = vld [vmem:[#allocation7 + $0xe4] ss:$8 sps:$4 sm:$0xff]  }
 0x105   :  { %1396 = vmatprep.subr.bf16.mxu0 %v3559_v8  ;;  %v3702_v8 = vld [vmem:[#allocation7 + $0xf4] ss:$8 sps:$4 sm:$0xff]  }
 0x107   :  { %1334 = vmatmul.mubr.bf16.gmra.mrb[12].mxu0 %v3556_v11 }
 0x108   :  { %1397 = vmatpush1.bf16.msra.mxu0 %v3557_v12  ;;  %1343 = vmatprep.mubr.bf16.mxu0 %v3563_v13 }
 0x109   :  { %1398 = vmatprep.subr.bf16.mxu0 %v3562_v14 }
 0x10c   :  { %1399 = vmatpush1.bf16.msra.mxu0 %v3560_v17 }
 0x10d   :  { %1400 = vmatprep.subr.bf16.mxu0 %v3568_v19 }
 0x10f   :  { %1344 = vmatmul.mubr.bf16.gmra.mrb[16].mxu0 %v3565_v22 }
 0x110   :  { %1401 = vmatpush1.bf16.msra.mxu0 %v3566_v23  ;;  %1353 = vmatprep.mubr.bf16.mxu0 %v3578_v24 }
 0x111   :  { %1402 = vmatprep.subr.bf16.mxu0 %v3574_v25 }
 0x114   :  { %1403 = vmatpush1.bf16.msra.mxu0 %v3572_v38 }
 0x115   :  { %1404 = vmatprep.subr.bf16.mxu0 %v3583_v29 }
 0x117   :  { %1354 = vmatmul.mubr.bf16.gmra.mrb[20].mxu0 %v3580_v32 }
 0x118   :  { %1405 = vmatpush1.bf16.msra.mxu0 %v3581_v33  ;;  %1363 = vmatprep.mubr.bf16.mxu0 %v3593_v34 }
 0x119   :  { %1406 = vmatprep.subr.bf16.mxu0 %v3589_v35 }
 0x11c   :  { %1407 = vmatpush1.bf16.msra.mxu0 %v3587_v42 }
 0x11d   :  { %1408 = vmatprep.subr.bf16.mxu0 %v3598_v43 }
 0x11f   :  { %1364 = vmatmul.mubr.bf16.gmra.mrb[24].mxu0 %v3595_v45 }
 0x120   :  { %1409 = vmatpush1.bf16.msra.mxu0 %v3596_v46  ;;  %1373 = vmatprep.mubr.bf16.mxu0 %v3608_v48  ;;  %v300_v46 = vlaneseq }
 0x121   :  { %1410 = vmatprep.subr.bf16.mxu0 %v3604_v49 }
 0x122   :  { %v4289_v48 = vshrl.u32 %v300_v46, 7 }
 0x124   :  { %1411 = vmatpush1.bf16.msra.mxu0 %v3602_v52  ;;  %v302_v49 = vsub.s32 0, %v4289_v48  ;;  %v298_v52 = vld [vmem:[%s4605_s2] sm:$0x3] }
 0x125   :  { %1412 = vmatprep.subr.bf16.mxu0 %v3613_v54  ;;  %v306_v54 = vsub.s32 1, %v4289_v48 }
 0x127   :  { %1374 = vmatmul.mubr.bf16.gmra.mrb[28].mxu0 %v3610_v55  ;;  %v4298_v55 = vrot.slane %v298_v52, %v302_v49 }
 0x128   :  { %1413 = vmatpush1.bf16.msra.mxu0 %v3611_v56  ;;  %1416 = vmatprep.mubr.bf16.mxu0 %v3625_v57  ;;  %v4302_v56 = vrot.slane %v298_v52, %v306_v54 }
 0x129   :  { %1414 = vmatprep.subr.bf16.mxu0 %v3619_v59 }
 0x12c   :  { %1415 = vmatpush1.bf16.msra.mxu0 %v3617_v61 }
 0x12d   :  { %1862 = vmatprep.subr.bf16.mxu0 %v4127_v37  ;;  %v3635_v37 = vld [vmem:[#allocation2 + $0xbc] ss:$28 sps:$4 sm:$0xff]  }
 0x12f   :  { %1417 = vmatmul.mubr.bf16.vlgmr.msra.gmra.mrb[0].mxu0 %v3623_v0 }
 0x130   :  { %1426 = vmatprep.mubr.bf16.mxu0 %v3627_v1  ;;  %1863 = vmatpush1.bf16.msra.mxu0 %v4129_v40  ;;  %v3637_v40 = vld [vmem:[#allocation2 + $0xb8] ss:$28 sps:$4 sm:$0xff]  }
 0x131   :  { %1864 = vmatprep.subr.bf16.mxu0 %v4132_v41  ;;  %v3639_v41 = vld [vmem:[#allocation2 + $0xf4] ss:$28 sps:$4 sm:$0xff]  }
 0x134   :  { %1865 = vmatpush1.bf16.msra.mxu0 %v4137_v47  ;;  %v3641_v47 = vld [vmem:[#allocation2 + $0xf0] ss:$28 sps:$4 sm:$0xff]  }
 0x135   :  { %1866 = vmatprep.subr.bf16.mxu0 %v4142_v51  ;;  %v3645_v51 = vld [vmem:[#allocation2 + $0x128] ss:$28 sps:$4 sm:$0xff]  }
 0x137   :  { %1427 = vmatmul.mubr.bf16.gmra.mrb[4].mxu0 %v3629_v2 }
 0x138   :  { %1436 = vmatprep.mubr.bf16.mxu0 %v3631_v3  ;;  %1867 = vmatpush1.bf16.msra.mxu0 %v4140_v50  ;;  %v3643_v50 = vld [vmem:[#allocation2 + $0x12c] ss:$28 sps:$4 sm:$0xff]  }
 0x139   :  { %1868 = vmatprep.subr.bf16.mxu0 %v4144_v53  ;;  %v3647_v53 = vld [vmem:[#allocation2 + $0x164] ss:$28 sps:$4 sm:$0xff]  }
 0x13c   :  { %1869 = vmatpush1.bf16.msra.mxu0 %v4148_v58  ;;  %v3649_v58 = vld [vmem:[#allocation2 + $0x160] ss:$28 sps:$4 sm:$0xff]  }
 0x13d   :  { %1870 = vmatprep.subr.bf16.mxu0 %v4152_v60  ;;  %v3651_v60 = vld [vmem:[#allocation2 + $0x19c] ss:$28 sps:$4 sm:$0xff]  }
 0x13f   :  { %1437 = vmatmul.mubr.bf16.gmra.mrb[8].mxu0 %v3633_v4 }
 0x140   :  { %1446 = vmatprep.mubr.bf16.mxu0 %v3635_v37  ;;  %1871 = vmatpush1.bf16.msra.mxu0 %v4154_v62  ;;  %v3653_v62 = vld [vmem:[#allocation2 + $0x198] ss:$28 sps:$4 sm:$0xff]  }
 0x141   :  { %1872 = vmatprep.subr.bf16.mxu0 %v4157_v63  ;;  %v3696_v63 = vld [vmem:[#allocation7 + $0xd4] ss:$8 sps:$4 sm:$0xff]  }
 0x142   :  { %3246 = vmatprep.subr.bf16.mxu1 %v3696_v63 }
 0x144   :  { %1873 = vmatpush1.bf16.msra.mxu0 %v4161_v5  ;;  %v3694_v5 = vld [vmem:[#allocation7 + $0xd0] ss:$8 sps:$4 sm:$0xff]  }
 0x145   :  { %1874 = vmatprep.subr.bf16.mxu0 %v4165_v7  ;;  %3262 = vmatpush1.bf16.msra.mxu1 %v3694_v5  ;;  %v3697_v7 = vld [vmem:[#allocation7 + $0xe0] ss:$8 sps:$4 sm:$0xff]  }
 0x146   :  { %3247 = vmatprep.subr.bf16.mxu1 %v3699_v6 }
 0x147   :  { %1447 = vmatmul.mubr.bf16.gmra.mrb[12].mxu0 %v3637_v40 }
 0x148   :  { %1456 = vmatprep.mubr.bf16.mxu0 %v3639_v41  ;;  %1875 = vmatpush1.bf16.msra.mxu0 %v4167_v9  ;;  %v3700_v9 = vld [vmem:[#allocation7 + $0xf0] ss:$8 sps:$4 sm:$0xff]  }
 0x149   :  { %1876 = vmatprep.subr.bf16.mxu0 %v4170_v10  ;;  %3263 = vmatpush1.bf16.msra.mxu1 %v3697_v7 }
 0x14a   :  { %3248 = vmatprep.subr.bf16.mxu1 %v3702_v8 }
 0x14c   :  { %1877 = vmatpush1.bf16.msra.mxu0 %v4174_v16 }
 0x14d   :  { %1878 = vmatprep.subr.bf16.mxu0 %v4179_v18  ;;  %3264 = vmatpush1.bf16.msra.mxu1 %v3700_v9 }
 0x14e   :  { %3073 = vmatprep.subr.bf16.mxu1 %v3703_v26 }
 0x14f   :  { %1457 = vmatmul.mubr.bf16.gmra.mrb[16].mxu0 %v3641_v47 }
 0x150   :  { %1466 = vmatprep.mubr.bf16.mxu0 %v3643_v50  ;;  %1879 = vmatpush1.bf16.msra.mxu0 %v4181_v20 }
 0x151   :  { %1880 = vmatprep.subr.bf16.mxu0 %v4184_v21 }
 0x154   :  { %1881 = vmatpush1.bf16.msra.mxu0 %v4189_v27 }
 0x155   :  { %1882 = vmatprep.subr.bf16.mxu0 %v4192_v28 }
 0x157   :  { %1467 = vmatmul.mubr.bf16.gmra.mrb[20].mxu0 %v3645_v51 }
 0x158   :  { %1476 = vmatprep.mubr.bf16.mxu0 %v3647_v53  ;;  %1883 = vmatpush1.bf16.msra.mxu0 %v4194_v30 }
 0x159   :  { %1884 = vmatprep.subr.bf16.mxu0 %v4196_v31 }
 0x15c   :  { %1885 = vmatpush1.bf16.msra.mxu0 %v4201_v36 }
 0x15d   :  { %1886 = vmatprep.subr.bf16.mxu0 %v4203_v39 }
 0x15f   :  { %1477 = vmatmul.mubr.bf16.gmra.mrb[24].mxu0 %v3649_v58 }
 0x160   :  { %1486 = vmatprep.mubr.bf16.mxu0 %v3651_v60  ;;  %1887 = vmatpush1.bf16.msra.mxu0 %v4206_v44 }
 0x161   :  { %1888 = vmatprep.subr.bf16.mxu0 %v3696_v63 }
 0x164   :  { %1889 = vmatpush1.bf16.msra.mxu0 %v3694_v5 }
 0x165   :  { %1890 = vmatprep.subr.bf16.mxu0 %v3699_v6 }
 0x167   :  { %1487 = vmatmul.mubr.bf16.gmra.mrb[28].mxu0 %v3653_v62 }
 0x168   :  { %1891 = vmatpush1.bf16.msra.mxu0 %v3697_v7 }
 0x169   :  { %1892 = vmatprep.subr.bf16.mxu0 %v3702_v8 }
 0x16c   :  { %1893 = vmatpush1.bf16.msra.mxu0 %v3700_v9 }
 0x170   :  { %v1531_v10 = vpop.f32.mrb[0].mxu1 }
 0x171   :  { %v1533_v11 = vpop.f32.mrb[1].mxu1 }
 0x172   :  { %v1535_v12 = vpop.f32.mrb[2].mxu1 }
 0x173   :  { %v1537_v13 = vpop.f32.mrb[3].mxu1 }
 0x178   :  { %v1541_v14 = vpop.f32.mrb[4].mxu1 }
 0x179   :  { %v1543_v15 = vpop.f32.mrb[5].mxu1 }
 0x17a   :  { %v4236_v16 = vpop.f32.mrb[6].mxu1 }
 0x17b   :  { %v4238_v17 = vpop.f32.mrb[7].mxu1 }
 0x184   :  { %v4240_v18 = vpop.f32.mrb[8].mxu1 }
 0x185   :  { %v4242_v19 = vpop.f32.mrb[9].mxu1 }
 0x186   :  { %v4244_v20 = vpop.f32.mrb[10].mxu1 }
 0x187   :  { %v4246_v21 = vpop.f32.mrb[11].mxu1 }
 0x18d   :  { %v4248_v22 = vpop.f32.mrb[12].mxu1 }
 0x18e   :  { %v4250_v23 = vpop.f32.mrb[13].mxu1 }
 0x18f   :  { %v4252_v24 = vpop.f32.mrb[14].mxu1 }
 0x190   :  { %v4254_v25 = vpop.f32.mrb[15].mxu1 }
 0x196   :  { %v4256_v27 = vpop.f32.mrb[16].mxu1 }
 0x197   :  { %v4258_v38 = vpop.f32.mrb[17].mxu1 }
 0x198   :  { %v4260_v28 = vpop.f32.mrb[18].mxu1 }
 0x199   :  { %v4262_v29 = vpop.f32.mrb[19].mxu1 }
 0x1a0   :  { %v4264_v30 = vpop.f32.mrb[20].mxu1 }
 0x1a1   :  { %v4266_v31 = vpop.f32.mrb[21].mxu1 }
 0x1a2   :  { %v4268_v32 = vpop.f32.mrb[22].mxu1 }
 0x1a3   :  { %v4270_v33 = vpop.f32.mrb[23].mxu1 }
 0x1aa   :  { %v4272_v34 = vpop.f32.mrb[24].mxu1 }
 0x1ab   :  { %v4274_v35 = vpop.f32.mrb[25].mxu1 }
 0x1ac   :  { %v4276_v36 = vpop.f32.mrb[26].mxu1 }
 0x1ad   :  { %v4278_v39 = vpop.f32.mrb[27].mxu1 }
 0x1b5   :  { %v4280_v42 = vpop.f32.mrb[28].mxu1 }
 0x1b6   :  { %v4282_v43 = vpop.f32.mrb[29].mxu1 }
 0x1b7   :  { %v4284_v44 = vpop.f32.mrb[30].mxu1 }
 0x1b8   :  { %v4286_v45 = vpop.f32.mrb[31].mxu1 }
 0x202   :  { %v1418_v57 = vpop.f32.mrb[0].mxu0 }
 0x203   :  { %v3265_v59 = vadd.f32 %v1418_v57, %v4298_v55  ;;  %v1420_v61 = vpop.f32.mrb[1].mxu0 }
 0x204   :  { %v3267_v0 = vadd.f32 %v1420_v61, %v4302_v56  ;;  %v1422_v1 = vpop.f32.mrb[2].mxu0 }
 0x205   :  { %v3266_v2 = vadd.f32 %v3265_v59, %v1531_v10  ;;  %v3269_v3 = vadd.f32 %v1422_v1, %v4298_v55  ;;  %v1424_v4 = vpop.f32.mrb[3].mxu0 }
 0x206   :  { %v3268_v37 = vadd.f32 %v3267_v0, %v1533_v11  ;;  %v3271_v40 = vadd.f32 %v1424_v4, %v4302_v56 }
 0x207   :  { %v3270_v41 = vadd.f32 %v3269_v3, %v1535_v12  ;;  %v1610_v50 = vmax.f32 %v3266_v2, 0.0 }
 0x208   :  { %v3272_v47 = vadd.f32 %v3271_v40, %v1537_v13  ;;  %v1611_v53 = vmax.f32 %v3268_v37, 0.0 }
 0x209   :  { %v1612_v51 = vmax.f32 %v3270_v41, 0.0 }
 0x20a   :  { %v1613_v58 = vmax.f32 %v3272_v47, 0.0  ;;  %v1428_v60 = vpop.f32.mrb[4].mxu0 }
 0x20b   :  { %v1642_v62 = vpack.c.bf16 %v1612_v51, %v1610_v50  ;;  %v3273_v63 = vadd.f32 %v1428_v60, %v4298_v55  ;;  %v1430_v5 = vpop.f32.mrb[5].mxu0 }
 0x20c   :  { %v1643_v6 = vpack.c.bf16 %v1613_v58, %v1611_v53  ;;  %v3275_v7 = vadd.f32 %v1430_v5, %v4302_v56  ;;  %v1432_v8 = vpop.f32.mrb[6].mxu0 }
 0x20d   :  { %v3274_v9 = vadd.f32 %v3273_v63, %v1541_v14  ;;  %v3277_v10 = vadd.f32 %v1432_v8, %v4298_v55  ;;  %v1434_v11 = vpop.f32.mrb[7].mxu0 }
 0x20e   :  { %v3276_v26 = vadd.f32 %v3275_v7, %v1543_v15  ;;  %v3279_v12 = vadd.f32 %v1434_v11, %v4302_v56  ;;  %1894 = vmatprep.mubr.bf16.mxu0 %v1643_v6 }
 0x20f   :  { %v3278_v13 = vadd.f32 %v3277_v10, %v4236_v16  ;;  %1895 = vmatmul.mubr.bf16.vlgmr.msra.gmra.mrb[32].mxu0 %v1642_v62  ;;  %v1614_v57 = vmax.f32 %v3274_v9, 0.0  ;;  %v3704_v9 = vld [vmem:[#allocation8] sm:$0xff]  }
 0x210   :  { %v3280_v52 = vadd.f32 %v3279_v12, %v4238_v17  ;;  %v1615_v61 = vmax.f32 %v3276_v26, 0.0 }
 0x211   :  { %v1616_v59 = vmax.f32 %v3278_v13, 0.0 }
 0x212   :  { %v1617_v0 = vmax.f32 %v3280_v52, 0.0  ;;  %v1438_v1 = vpop.f32.mrb[8].mxu0 }
 0x213   :  { %v1644_v2 = vpack.c.bf16 %v1616_v59, %v1614_v57  ;;  %v3281_v14 = vadd.f32 %v1438_v1, %v4298_v55  ;;  %v1440_v3 = vpop.f32.mrb[9].mxu0  ;;  %v3706_v57 = vld [vmem:[#allocation8 + $0x8] sm:$0xff]  }
 0x214   :  { %v1645_v4 = vpack.c.bf16 %v1617_v0, %v1615_v61  ;;  %v3283_v15 = vadd.f32 %v1440_v3, %v4302_v56  ;;  %v1442_v37 = vpop.f32.mrb[10].mxu0 }
 0x215   :  { %v3282_v40 = vadd.f32 %v3281_v14, %v4240_v18  ;;  %v3285_v16 = vadd.f32 %v1442_v37, %v4298_v55  ;;  %v1444_v41 = vpop.f32.mrb[11].mxu0  ;;  %v3708_v37 = vld [vmem:[#allocation8 + $0x10] sm:$0xff]  }
 0x216   :  { %v3284_v17 = vadd.f32 %v3283_v15, %v4242_v19  ;;  %v3287_v47 = vadd.f32 %v1444_v41, %v4302_v56  ;;  %1904 = vmatprep.mubr.bf16.mxu0 %v1645_v4  ;;  %v3709_v41 = vld [vmem:[#allocation8 + $0x58] sm:$0xff]  }
 0x217   :  { %v3286_v50 = vadd.f32 %v3285_v16, %v4244_v20  ;;  %1905 = vmatmul.mubr.bf16.gmra.mrb[36].mxu0 %v1644_v2  ;;  %v1618_v53 = vmax.f32 %v3282_v40, 0.0 }
 0x218   :  { %v3288_v51 = vadd.f32 %v3287_v47, %v4246_v21  ;;  %v1619_v60 = vmax.f32 %v3284_v17, 0.0  ;;  %v3705_v21 = vld [vmem:[#allocation8 + $0x48] sm:$0xff]  }
 0x219   :  { %v1620_v58 = vmax.f32 %v3286_v50, 0.0 }
 0x21a   :  { %v1621_v62 = vmax.f32 %v3288_v51, 0.0  ;;  %v1448_v63 = vpop.f32.mrb[12].mxu0 }
 0x21b   :  { %v1646_v5 = vpack.c.bf16 %v1620_v58, %v1618_v53  ;;  %v3289_v18 = vadd.f32 %v1448_v63, %v4298_v55  ;;  %v1450_v6 = vpop.f32.mrb[13].mxu0  ;;  %v3710_v53 = vld [vmem:[#allocation8 + $0x18] sm:$0xff]  }
 0x21c   :  { %v1647_v7 = vpack.c.bf16 %v1621_v62, %v1619_v60  ;;  %v3291_v19 = vadd.f32 %v1450_v6, %v4302_v56  ;;  %v1452_v8 = vpop.f32.mrb[14].mxu0 }
 0x21d   :  { %v3290_v10 = vadd.f32 %v3289_v18, %v4248_v22  ;;  %v3293_v20 = vadd.f32 %v1452_v8, %v4298_v55  ;;  %v1454_v11 = vpop.f32.mrb[15].mxu0  ;;  %v3707_v22 = vld [vmem:[#allocation8 + $0x50] sm:$0xff]   ;;  %v3712_v8 = vld [vmem:[#allocation8 + $0x20] sm:$0xff]  }
 0x21e   :  { %v3292_v26 = vadd.f32 %v3291_v19, %v4250_v23  ;;  %v3295_v12 = vadd.f32 %v1454_v11, %v4302_v56  ;;  %1914 = vmatprep.mubr.bf16.mxu1 %v1647_v7 }
 0x21f   :  { %v3294_v13 = vadd.f32 %v3293_v20, %v4252_v24  ;;  %1915 = vmatmul.mubr.bf16.vlgmr.msra.gmra.mrb[32].mxu1 %v1646_v5  ;;  %v1622_v59 = vmax.f32 %v3290_v10, 0.0  ;;  %v3713_v20 = vld [vmem:[#allocation8 + $0x68] sm:$0xff]  }
 0x220   :  { %v3296_v52 = vadd.f32 %v3295_v12, %v4254_v25  ;;  %3074 = vmatpush3.bf16.msra.mxu1 %v3704_v9  ;;  %v1623_v0 = vmax.f32 %v3292_v26, 0.0 }
 0x221   :  { %v1624_v61 = vmax.f32 %v3294_v13, 0.0  ;;  %3075 = vmatprep.subr.bf16.mxu1 %v3705_v21  ;;  %v3714_v13 = vld [vmem:[#allocation8 + $0x28] sm:$0xff]  }
 0x222   :  { %v1625_v1 = vmax.f32 %v3296_v52, 0.0  ;;  %v1458_v2 = vpop.f32.mrb[16].mxu0 }
 0x223   :  { %v1648_v14 = vpack.c.bf16 %v1624_v61, %v1622_v59  ;;  %v3297_v23 = vadd.f32 %v1458_v2, %v4298_v55  ;;  %v1460_v3 = vpop.f32.mrb[17].mxu0 }
 0x224   :  { %v1649_v4 = vpack.c.bf16 %v1625_v1, %v1623_v0  ;;  %v3299_v15 = vadd.f32 %v1460_v3, %v4302_v56  ;;  %v1462_v24 = vpop.f32.mrb[18].mxu0  ;;  %3076 = vmatpush3.bf16.msra.mxu1 %v3706_v57 }
 0x225   :  { %v3298_v25 = vadd.f32 %v3297_v23, %v4256_v27  ;;  %v3301_v40 = vadd.f32 %v1462_v24, %v4298_v55  ;;  %v1464_v16 = vpop.f32.mrb[19].mxu0  ;;  %3077 = vmatprep.subr.bf16.mxu1 %v3707_v22  ;;  %v3711_v27 = vld [vmem:[#allocation8 + $0x60] sm:$0xff]  }
 0x226   :  { %v3300_v17 = vadd.f32 %v3299_v15, %v4258_v38  ;;  %v3303_v47 = vadd.f32 %v1464_v16, %v4302_v56  ;;  %1924 = vmatprep.mubr.bf16.mxu1 %v1649_v4 }
 0x227   :  { %v3302_v50 = vadd.f32 %v3301_v40, %v4260_v28  ;;  %1925 = vmatmul.mubr.bf16.gmra.mrb[36].mxu1 %v1648_v14  ;;  %v1626_v58 = vmax.f32 %v3298_v25, 0.0 }
 0x228   :  { %v3304_v51 = vadd.f32 %v3303_v47, %v4262_v29  ;;  %3078 = vmatpush3.bf16.msra.mxu1 %v3708_v37  ;;  %v1627_v62 = vmax.f32 %v3300_v17, 0.0 }
 0x229   :  { %v1628_v60 = vmax.f32 %v3302_v50, 0.0  ;;  %3079 = vmatprep.subr.bf16.mxu1 %v3709_v41 }
 0x22a   :  { %v1629_v63 = vmax.f32 %v3304_v51, 0.0  ;;  %v1468_v5 = vpop.f32.mrb[20].mxu0 }
 0x22b   :  { %v1650_v18 = vpack.c.bf16 %v1628_v60, %v1626_v58  ;;  %v3305_v38 = vadd.f32 %v1468_v5, %v4298_v55  ;;  %v1470_v6 = vpop.f32.mrb[21].mxu0 }
 0x22c   :  { %v1651_v7 = vpack.c.bf16 %v1629_v63, %v1627_v62  ;;  %v3307_v19 = vadd.f32 %v1470_v6, %v4302_v56  ;;  %v1472_v28 = vpop.f32.mrb[22].mxu0  ;;  %3080 = vmatpush3.bf16.msra.mxu1 %v3710_v53 }
 0x22d   :  { %v3306_v29 = vadd.f32 %v3305_v38, %v4264_v30  ;;  %v3309_v9 = vadd.f32 %v1472_v28, %v4298_v55  ;;  %v1474_v10 = vpop.f32.mrb[23].mxu0  ;;  %3081 = vmatprep.subr.bf16.mxu1 %v3711_v27  ;;  %v3715_v30 = vld [vmem:[#allocation8 + $0x70] sm:$0xff]  }
 0x22e   :  { %v3308_v11 = vadd.f32 %v3307_v19, %v4266_v31  ;;  %v3311_v21 = vadd.f32 %v1474_v10, %v4302_v56  ;;  %1934 = vmatprep.mubr.bf16.mxu1 %v1651_v7 }
 0x22f   :  { %v3310_v26 = vadd.f32 %v3309_v9, %v4268_v32  ;;  %1935 = vmatmul.mubr.bf16.gmra.mrb[40].mxu1 %v1650_v18  ;;  %v1630_v52 = vmax.f32 %v3306_v29, 0.0 }
 0x230   :  { %v3312_v12 = vadd.f32 %v3311_v21, %v4270_v33  ;;  %3082 = vmatpush3.bf16.msra.mxu1 %v3712_v8  ;;  %v1631_v59 = vmax.f32 %v3308_v11, 0.0 }
 0x231   :  { %v1632_v57 = vmax.f32 %v3310_v26, 0.0  ;;  %3083 = vmatprep.subr.bf16.mxu1 %v3713_v20 }
 0x232   :  { %v1633_v61 = vmax.f32 %v3312_v12, 0.0  ;;  %v1478_v22 = vpop.f32.mrb[24].mxu0 }
 0x233   :  { %v1652_v0 = vpack.c.bf16 %v1632_v57, %v1630_v52  ;;  %v3313_v31 = vadd.f32 %v1478_v22, %v4298_v55  ;;  %v1480_v1 = vpop.f32.mrb[25].mxu0 }
 0x234   :  { %v1653_v2 = vpack.c.bf16 %v1633_v61, %v1631_v59  ;;  %v3315_v14 = vadd.f32 %v1480_v1, %v4302_v56  ;;  %v1482_v32 = vpop.f32.mrb[26].mxu0  ;;  %3084 = vmatpush3.bf16.msra.mxu1 %v3714_v13  ;;  %v3720_v61 = vld [vmem:[#allocation10 + $0x8] sm:$0xff]  }
 0x235   :  { %v3314_v33 = vadd.f32 %v3313_v31, %v4272_v34  ;;  %v3317_v23 = vadd.f32 %v1482_v32, %v4298_v55  ;;  %v1484_v3 = vpop.f32.mrb[27].mxu0  ;;  %3085 = vmatprep.subr.bf16.mxu1 %v3715_v30 }
 0x236   :  { %v3316_v4 = vadd.f32 %v3315_v14, %v4274_v35  ;;  %v3319_v15 = vadd.f32 %v1484_v3, %v4302_v56  ;;  %1944 = vmatprep.mubr.bf16.mxu1 %v1653_v2 }
 0x237   :  { %v3318_v24 = vadd.f32 %v3317_v23, %v4276_v36  ;;  %1945 = vmatmul.mubr.bf16.gmra.mrb[44].mxu1 %v1652_v0  ;;  %v1634_v25 = vmax.f32 %v3314_v33, 0.0  ;;  %v3721_v33 = vld [vmem:[#allocation10 + $0x10] sm:$0xff]  }
 0x238   :  { %v3320_v37 = vadd.f32 %v3319_v15, %v4278_v39  ;;  %v1635_v16 = vmax.f32 %v3316_v4, 0.0 }
 0x239   :  { %v1636_v40 = vmax.f32 %v3318_v24, 0.0 }
 0x23a   :  { %v1637_v41 = vmax.f32 %v3320_v37, 0.0  ;;  %v1488_v17 = vpop.f32.mrb[28].mxu0 }
 0x23b   :  { %v1654_v34 = vpack.c.bf16 %v1636_v40, %v1634_v25  ;;  %v3321_v47 = vadd.f32 %v1488_v17, %v4298_v55  ;;  %v1490_v50 = vpop.f32.mrb[29].mxu0 }
 0x23c   :  { %v1655_v51 = vpack.c.bf16 %v1637_v41, %v1635_v16  ;;  %v3323_v35 = vadd.f32 %v1490_v50, %v4302_v56  ;;  %v1492_v53 = vpop.f32.mrb[30].mxu0 }
 0x23d   :  { %v3322_v58 = vadd.f32 %v3321_v47, %v4280_v42  ;;  %v3325_v36 = vadd.f32 %v1492_v53, %v4298_v55  ;;  %v1494_v60 = vpop.f32.mrb[31].mxu0  ;;  %v3716_v42 = vld [vmem:[#allocation8 + $0x30] sm:$0xff]   ;;  %v3717_v55 = vld [vmem:[#allocation8 + $0x78] sm:$0xff]  }
 0x23e   :  { %v3324_v39 = vadd.f32 %v3323_v35, %v4282_v43  ;;  %v3327_v27 = vadd.f32 %v1494_v60, %v4302_v56  ;;  %1954 = vmatprep.mubr.bf16.mxu1 %v1655_v51  ;;  %3086 = vmatpush3.bf16.msra.mxu1 %v3716_v42  ;;  %v3718_v43 = vld [vmem:[#allocation8 + $0x38] sm:$0xff]   ;;  %v3719_v56 = vld [vmem:[#allocation10] sm:$0xff]  }
 0x23f   :  { %v3326_v62 = vadd.f32 %v3325_v36, %v4284_v44  ;;  %1955 = vmatmul.mubr.bf16.gmra.mrb[48].mxu1 %v1654_v34  ;;  %v1638_v5 = vmax.f32 %v3322_v58, 0.0  ;;  %3087 = vmatprep.subr.bf16.mxu1 %v3717_v55  ;;  %v1690_v44 = vld [vmem:[%s4607_s4] sm:$0x3] }
 0x240   :  { %v3328_v63 = vadd.f32 %v3327_v27, %v4286_v45  ;;  %v1639_v38 = vmax.f32 %v3324_v39, 0.0  ;;  %v4367_v45 = vrot.slane %v1690_v44, %v302_v49  ;;  %v4371_v28 = vrot.slane %v1690_v44, %v306_v54 }
 0x241   :  { %v1640_v18 = vmax.f32 %v3326_v62, 0.0 }
 0x242   :  { %v1641_v6 = vmax.f32 %v3328_v63, 0.0  ;;  %3088 = vmatpush3.bf16.msra.mxu1 %v3718_v43 }
 0x243   :  { %v1656_v7 = vpack.c.bf16 %v1640_v18, %v1638_v5  ;;  %3169 = vmatprep.subr.bf16.mxu1 %v3719_v56 }
 0x244   :  { %v1657_v19 = vpack.c.bf16 %v1641_v6, %v1639_v38 }
 0x246   :  { %1964 = vmatprep.mubr.bf16.mxu1 %v1657_v19 }
 0x247   :  { %1965 = vmatmul.mubr.bf16.gmra.mrb[52].mxu1 %v1656_v7 }
 0x2e2   :  { %v1896_v8 = vpop.f32.mrb[32].mxu0 }
 0x2e3   :  { %v1897_v29 = vadd.f32 %v1896_v8, %v4367_v45  ;;  %v1898_v9 = vpop.f32.mrb[33].mxu0 }
 0x2e4   :  { %v1899_v10 = vadd.f32 %v1898_v9, %v4371_v28  ;;  %v1900_v20 = vpop.f32.mrb[34].mxu0 }
 0x2e5   :  { %v1901_v11 = vadd.f32 %v1900_v20, %v4367_v45  ;;  %v1902_v21 = vpop.f32.mrb[35].mxu0  ;;  %v1975_v12 = vmax.f32 %v1897_v29, 0.0 }
 0x2e6   :  { %v1903_v26 = vadd.f32 %v1902_v21, %v4371_v28  ;;  %v1976_v49 = vmax.f32 %v1899_v10, 0.0 }
 0x2e7   :  { %v1977_v13 = vmax.f32 %v1901_v11, 0.0 }
 0x2e8   :  { %v1978_v52 = vmax.f32 %v1903_v26, 0.0 }
 0x2e9   :  { %v2007_v57 = vpack.c.bf16 %v1977_v13, %v1975_v12 }
 0x2ea   :  { %v2008_v48 = vpack.c.bf16 %v1978_v52, %v1976_v49  ;;  %v1906_v54 = vpop.f32.mrb[36].mxu0 }
 0x2eb   :  { %v1907_v30 = vadd.f32 %v1906_v54, %v4367_v45  ;;  %v1908_v59 = vpop.f32.mrb[37].mxu0 }
 0x2ec   :  { %v1909_v22 = vadd.f32 %v1908_v59, %v4371_v28  ;;  %v1910_v0 = vpop.f32.mrb[38].mxu0  ;;  %2190 = vmatprep.mubr.bf16.mxu1 %v2008_v48 }
 0x2ed   :  { %v1911_v31 = vadd.f32 %v1910_v0, %v4367_v45  ;;  %v1912_v1 = vpop.f32.mrb[39].mxu0  ;;  %2191 = vmatmul.mubr.bf16.vlgmr.msra.gmra.mrb[56].mxu1 %v2007_v57  ;;  %v1979_v14 = vmax.f32 %v1907_v30, 0.0 }
 0x2ee   :  { %v1913_v2 = vadd.f32 %v1912_v1, %v4371_v28  ;;  %3170 = vmatpush3.bf16.msra.mxu1 %v3719_v56  ;;  %v1980_v23 = vmax.f32 %v1909_v22, 0.0 }
 0x2ef   :  { %v1981_v32 = vmax.f32 %v1911_v31, 0.0  ;;  %3171 = vmatprep.subr.bf16.mxu1 %v3720_v61 }
 0x2f0   :  { %v1982_v3 = vmax.f32 %v1913_v2, 0.0 }
 0x2f1   :  { %v2009_v4 = vpack.c.bf16 %v1981_v32, %v1979_v14 }
 0x2f2   :  { %v2010_v15 = vpack.c.bf16 %v1982_v3, %v1980_v23  ;;  %v1916_v24 = vpop.f32.mrb[32].mxu1  ;;  %3172 = vmatpush3.bf16.msra.mxu1 %v3720_v61 }
 0x2f3   :  { %v1917_v37 = vadd.f32 %v1916_v24, %v4367_v45  ;;  %v1918_v25 = vpop.f32.mrb[33].mxu1  ;;  %3173 = vmatprep.subr.bf16.mxu1 %v3721_v33 }
 0x2f4   :  { %v1919_v40 = vadd.f32 %v1918_v25, %v4371_v28  ;;  %v1920_v16 = vpop.f32.mrb[34].mxu1  ;;  %2198 = vmatprep.mubr.bf16.mxu1 %v2010_v15 }
 0x2f5   :  { %v1921_v41 = vadd.f32 %v1920_v16, %v4367_v45  ;;  %v1922_v17 = vpop.f32.mrb[35].mxu1  ;;  %2199 = vmatmul.mubr.bf16.gmra.mrb[60].mxu1 %v2009_v4  ;;  %v1983_v47 = vmax.f32 %v1917_v37, 0.0 }
 0x2f6   :  { %v1923_v34 = vadd.f32 %v1922_v17, %v4371_v28  ;;  %3174 = vmatpush3.bf16.msra.mxu1 %v3721_v33  ;;  %v1984_v51 = vmax.f32 %v1919_v40, 0.0 }
 0x2f7   :  { %v1985_v50 = vmax.f32 %v1921_v41, 0.0 }
 0x2f8   :  { %v1986_v35 = vmax.f32 %v1923_v34, 0.0 }
 0x2f9   :  { %v2011_v53 = vpack.c.bf16 %v1985_v50, %v1983_v47 }
 0x2fa   :  { %v2012_v58 = vpack.c.bf16 %v1986_v35, %v1984_v51  ;;  %v1926_v36 = vpop.f32.mrb[36].mxu1 }
 0x2fb   :  { %v1927_v60 = vadd.f32 %v1926_v36, %v4367_v45  ;;  %v1928_v39 = vpop.f32.mrb[37].mxu1 }
 0x2fc   :  { %v1929_v27 = vadd.f32 %v1928_v39, %v4371_v28  ;;  %v1930_v62 = vpop.f32.mrb[38].mxu1  ;;  %2206 = vmatprep.mubr.bf16.mxu1 %v2012_v58 }
 0x2fd   :  { %v1931_v63 = vadd.f32 %v1930_v62, %v4367_v45  ;;  %v1932_v5 = vpop.f32.mrb[39].mxu1  ;;  %2207 = vmatmul.mubr.bf16.gmra.mrb[64].mxu1 %v2011_v53  ;;  %v1987_v38 = vmax.f32 %v1927_v60, 0.0 }
 0x2fe   :  { %v1933_v18 = vadd.f32 %v1932_v5, %v4371_v28  ;;  %v1988_v7 = vmax.f32 %v1929_v27, 0.0 }
 0x2ff   :  { %v1989_v6 = vmax.f32 %v1931_v63, 0.0 }
 0x300   :  { %v1990_v19 = vmax.f32 %v1933_v18, 0.0 }
 0x301   :  { %v2013_v42 = vpack.c.bf16 %v1989_v6, %v1987_v38  ;;  %v3722_v6 = vld [vmem:[#allocation10 + $0x18] sm:$0xff]  }
 0x302   :  { %v2014_v55 = vpack.c.bf16 %v1990_v19, %v1988_v7  ;;  %v1936_v43 = vpop.f32.mrb[40].mxu1  ;;  %3175 = vmatprep.subr.bf16.mxu1 %v3722_v6  ;;  %v3723_v7 = vld [vmem:[#allocation10 + $0x20] sm:$0xff]   ;;  %v3724_v19 = vld [vmem:[#allocation10 + $0x28] sm:$0xff]  }
 0x303   :  { %v1937_v56 = vadd.f32 %v1936_v43, %v4367_v45  ;;  %v1938_v44 = vpop.f32.mrb[41].mxu1  ;;  %3176 = vmatpush3.bf16.msra.mxu1 %v3722_v6  ;;  %v4408_v43 = vld [vmem:[%s4609_s6] ss:$0 sm:$0xff] }
 0x304   :  { %v1939_v8 = vadd.f32 %v1938_v44, %v4371_v28  ;;  %v1940_v29 = vpop.f32.mrb[42].mxu1  ;;  %2214 = vmatprep.mubr.bf16.mxu1 %v2014_v55  ;;  %3177 = vmatprep.subr.bf16.mxu1 %v3723_v7 }
 0x305   :  { %v1941_v9 = vadd.f32 %v1940_v29, %v4367_v45  ;;  %v1942_v10 = vpop.f32.mrb[43].mxu1  ;;  %2215 = vmatmul.mubr.bf16.gmra.mrb[68].mxu1 %v2013_v42  ;;  %v1991_v11 = vmax.f32 %v1937_v56, 0.0  ;;  %v3727_v42 = vld [vmem:[#allocation11] sm:$0xff]  }
 0x306   :  { %v1943_v20 = vadd.f32 %v1942_v10, %v4371_v28  ;;  %v1992_v26 = vmax.f32 %v1939_v8, 0.0 }
 0x307   :  { %v1993_v21 = vmax.f32 %v1941_v9, 0.0  ;;  %3178 = vmatpush3.bf16.msra.mxu1 %v3723_v7 }
 0x308   :  { %v1994_v12 = vmax.f32 %v1943_v20, 0.0  ;;  %3179 = vmatprep.subr.bf16.mxu1 %v3724_v19 }
 0x309   :  { %v2015_v13 = vpack.c.bf16 %v1993_v21, %v1991_v11 }
 0x30a   :  { %v2016_v49 = vpack.c.bf16 %v1994_v12, %v1992_v26  ;;  %v1946_v52 = vpop.f32.mrb[44].mxu1 }
 0x30b   :  { %v1947_v57 = vadd.f32 %v1946_v52, %v4367_v45  ;;  %v1948_v48 = vpop.f32.mrb[45].mxu1  ;;  %3180 = vmatpush3.bf16.msra.mxu1 %v3724_v19 }
 0x30c   :  { %v1949_v54 = vadd.f32 %v1948_v48, %v4371_v28  ;;  %v1950_v30 = vpop.f32.mrb[46].mxu1  ;;  %2222 = vmatprep.mubr.bf16.mxu1 %v2016_v49 }
 0x30d   :  { %v1951_v59 = vadd.f32 %v1950_v30, %v4367_v45  ;;  %v1952_v61 = vpop.f32.mrb[47].mxu1  ;;  %2223 = vmatmul.mubr.bf16.gmra.mrb[72].mxu1 %v2015_v13  ;;  %v1995_v0 = vmax.f32 %v1947_v57, 0.0 }
 0x30e   :  { %v1953_v22 = vadd.f32 %v1952_v61, %v4371_v28  ;;  %v1996_v1 = vmax.f32 %v1949_v54, 0.0 }
 0x30f   :  { %v1997_v31 = vmax.f32 %v1951_v59, 0.0 }
 0x310   :  { %v1998_v2 = vmax.f32 %v1953_v22, 0.0 }
 0x311   :  { %v2017_v14 = vpack.c.bf16 %v1997_v31, %v1995_v0 }
 0x312   :  { %v2018_v32 = vpack.c.bf16 %v1998_v2, %v1996_v1  ;;  %v1956_v33 = vpop.f32.mrb[48].mxu1 }
 0x313   :  { %v1957_v23 = vadd.f32 %v1956_v33, %v4367_v45  ;;  %v1958_v3 = vpop.f32.mrb[49].mxu1 }
 0x314   :  { %v1959_v4 = vadd.f32 %v1958_v3, %v4371_v28  ;;  %v1960_v15 = vpop.f32.mrb[50].mxu1  ;;  %2230 = vmatprep.mubr.bf16.mxu1 %v2018_v32 }
 0x315   :  { %v1961_v24 = vadd.f32 %v1960_v15, %v4367_v45  ;;  %v1962_v37 = vpop.f32.mrb[51].mxu1  ;;  %2231 = vmatmul.mubr.bf16.gmra.mrb[76].mxu1 %v2017_v14  ;;  %v1999_v40 = vmax.f32 %v1957_v23, 0.0  ;;  %v3728_v14 = vld [vmem:[#allocation11 + $0x8] sm:$0xff]  }
 0x316   :  { %v1963_v25 = vadd.f32 %v1962_v37, %v4371_v28  ;;  %v2000_v41 = vmax.f32 %v1959_v4, 0.0  ;;  %v3729_v4 = vld [vmem:[#allocation11 + $0x10] sm:$0xff]  }
 0x317   :  { %v2001_v16 = vmax.f32 %v1961_v24, 0.0 }
 0x318   :  { %v2002_v17 = vmax.f32 %v1963_v25, 0.0 }
 0x319   :  { %v2019_v34 = vpack.c.bf16 %v2001_v16, %v1999_v40 }
 0x31a   :  { %v2020_v47 = vpack.c.bf16 %v2002_v17, %v2000_v41  ;;  %v1966_v50 = vpop.f32.mrb[52].mxu1  ;;  %v3730_v17 = vld [vmem:[#allocation11 + $0x18] sm:$0xff]  }
 0x31b   :  { %v1967_v51 = vadd.f32 %v1966_v50, %v4367_v45  ;;  %v1968_v35 = vpop.f32.mrb[53].mxu1 }
 0x31c   :  { %v1969_v53 = vadd.f32 %v1968_v35, %v4371_v28  ;;  %v1970_v58 = vpop.f32.mrb[54].mxu1  ;;  %2238 = vmatprep.mubr.bf16.mxu1 %v2020_v47  ;;  %v3731_v35 = vld [vmem:[#allocation11 + $0x20] sm:$0xff]  }
 0x31d   :  { %v1971_v36 = vadd.f32 %v1970_v58, %v4367_v45  ;;  %v1972_v60 = vpop.f32.mrb[55].mxu1  ;;  %2239 = vmatmul.mubr.bf16.gmra.mrb[80].mxu1 %v2019_v34  ;;  %v2003_v27 = vmax.f32 %v1967_v51, 0.0  ;;  %v3725_v45 = vld [vmem:[#allocation10 + $0x30] sm:$0xff]  }
 0x31e   :  { %v1973_v39 = vadd.f32 %v1972_v60, %v4371_v28  ;;  %v2004_v63 = vmax.f32 %v1969_v53, 0.0  ;;  %3181 = vmatprep.subr.bf16.mxu1 %v3725_v45  ;;  %v3726_v28 = vld [vmem:[#allocation10 + $0x38] sm:$0xff]  }
 0x31f   :  { %v2005_v62 = vmax.f32 %v1971_v36, 0.0  ;;  %3182 = vmatpush3.bf16.msra.mxu1 %v3725_v45 }
 0x320   :  { %v2006_v5 = vmax.f32 %v1973_v39, 0.0  ;;  %3183 = vmatprep.subr.bf16.mxu1 %v3726_v28 }
 0x321   :  { %v2021_v18 = vpack.c.bf16 %v2005_v62, %v2003_v27 }
 0x322   :  { %v2022_v38 = vpack.c.bf16 %v2006_v5, %v2004_v63  ;;  %v3732_v63 = vld [vmem:[#allocation11 + $0x28] sm:$0xff]  }
 0x323   :  { %3184 = vmatpush3.bf16.msra.mxu1 %v3726_v28 }
 0x324   :  { %2246 = vmatprep.mubr.bf16.mxu1 %v2022_v38  ;;  %3201 = vmatprep.subr.bf16.mxu1 %v3727_v42 }
 0x325   :  { %2247 = vmatmul.mubr.bf16.gmra.mrb[84].mxu1 %v2021_v18 }
 0x3c0   :  { %v3089_v55 = vpop.f32.mrb[56].mxu1 }
 0x3c1   :  { %v3090_v56 = vpop.f32.mrb[57].mxu1 }
 0x3c2   :  { %v3091_v44 = vadd.f32 %v3090_v56, %v3089_v55  ;;  %v3092_v8 = vpop.f32.mrb[58].mxu1 }
 0x3c3   :  { %v3093_v29 = vpop.f32.mrb[59].mxu1 }
 0x3c4   :  { %v2193_v9 = vadd.f32 %v3091_v44, %v4408_v43  ;;  %v3094_v10 = vadd.f32 %v3093_v29, %v3092_v8 }
 0x3c6   :  { %v2196_v20 = vadd.f32 %v3094_v10, %v4408_v43  ;;  %v2255_v11 = vmax.f32 %v2193_v9, 0.0 }
 0x3c8   :  { %v2256_v21 = vmax.f32 %v2196_v20, 0.0  ;;  %v3095_v26 = vpop.f32.mrb[60].mxu1 }
 0x3c9   :  { %v3096_v12 = vpop.f32.mrb[61].mxu1 }
 0x3ca   :  { %v3097_v13 = vadd.f32 %v3096_v12, %v3095_v26  ;;  %v3098_v49 = vpop.f32.mrb[62].mxu1  ;;  %v2271_v52 = vpack.c.bf16 %v2256_v21, %v2255_v11 }
 0x3cb   :  { %v3099_v57 = vpop.f32.mrb[63].mxu1 }
 0x3cc   :  { %v2201_v48 = vadd.f32 %v3097_v13, %v4408_v43  ;;  %v3100_v54 = vadd.f32 %v3099_v57, %v3098_v49  ;;  %3185 = vmatprep.mubr.bf16.mxu1 %v2271_v52 }
 0x3ce   :  { %v2204_v30 = vadd.f32 %v3100_v54, %v4408_v43  ;;  %v2257_v59 = vmax.f32 %v2201_v48, 0.0 }
 0x3d0   :  { %v2258_v61 = vmax.f32 %v2204_v30, 0.0  ;;  %v3101_v22 = vpop.f32.mrb[64].mxu1 }
 0x3d1   :  { %v3102_v0 = vpop.f32.mrb[65].mxu1 }
 0x3d2   :  { %v2272_v31 = vpack.c.bf16 %v2258_v61, %v2257_v59  ;;  %v3103_v1 = vadd.f32 %v3102_v0, %v3101_v22  ;;  %v3104_v2 = vpop.f32.mrb[66].mxu1 }
 0x3d3   :  { %v3105_v32 = vpop.f32.mrb[67].mxu1 }
 0x3d4   :  { %v2209_v33 = vadd.f32 %v3103_v1, %v4408_v43  ;;  %v3106_v23 = vadd.f32 %v3105_v32, %v3104_v2  ;;  %3186 = vmatmul.mubr.bf16.vlgmr.msra.gmra.mrb[88].mxu1 %v2272_v31 }
 0x3d5   :  { %3202 = vmatpush3.bf16.msra.mxu1 %v3727_v42 }
 0x3d6   :  { %v2212_v3 = vadd.f32 %v3106_v23, %v4408_v43  ;;  %3203 = vmatprep.subr.bf16.mxu1 %v3728_v14  ;;  %v2259_v15 = vmax.f32 %v2209_v33, 0.0 }
 0x3d8   :  { %v2260_v24 = vmax.f32 %v2212_v3, 0.0  ;;  %v3107_v37 = vpop.f32.mrb[68].mxu1 }
 0x3d9   :  { %v3108_v25 = vpop.f32.mrb[69].mxu1  ;;  %3204 = vmatpush3.bf16.msra.mxu1 %v3728_v14 }
 0x3da   :  { %v3109_v40 = vadd.f32 %v3108_v25, %v3107_v37  ;;  %v3110_v16 = vpop.f32.mrb[70].mxu1  ;;  %v2273_v41 = vpack.c.bf16 %v2260_v24, %v2259_v15  ;;  %3205 = vmatprep.subr.bf16.mxu1 %v3729_v4  ;;  %v3734_v15 = vld [vmem:[#allocation11 + $0x38] sm:$0xff]   ;;  %v3055_v24 = vld [vmem:[%s4611_s8] ss:$0 sm:$0xff] }
 0x3db   :  { %v3111_v34 = vpop.f32.mrb[71].mxu1 }
 0x3dc   :  { %v2217_v47 = vadd.f32 %v3109_v40, %v4408_v43  ;;  %v3112_v50 = vadd.f32 %v3111_v34, %v3110_v16  ;;  %3189 = vmatprep.mubr.bf16.mxu1 %v2273_v41 }
 0x3dd   :  { %3206 = vmatpush3.bf16.msra.mxu1 %v3729_v4  ;;  %v3733_v4 = vld [vmem:[#allocation11 + $0x30] sm:$0xff]  }
 0x3de   :  { %v2220_v51 = vadd.f32 %v3112_v50, %v4408_v43  ;;  %3207 = vmatprep.subr.bf16.mxu1 %v3730_v17  ;;  %v2261_v53 = vmax.f32 %v2217_v47, 0.0 }
 0x3e0   :  { %v2262_v58 = vmax.f32 %v2220_v51, 0.0  ;;  %v3113_v36 = vpop.f32.mrb[72].mxu1 }
 0x3e1   :  { %v3114_v60 = vpop.f32.mrb[73].mxu1  ;;  %3208 = vmatpush3.bf16.msra.mxu1 %v3730_v17 }
 0x3e2   :  { %v3115_v39 = vadd.f32 %v3114_v60, %v3113_v36  ;;  %v3116_v27 = vpop.f32.mrb[74].mxu1  ;;  %v2274_v62 = vpack.c.bf16 %v2262_v58, %v2261_v53  ;;  %3209 = vmatprep.subr.bf16.mxu1 %v3731_v35 }
 0x3e3   :  { %v3117_v5 = vpop.f32.mrb[75].mxu1 }
 0x3e4   :  { %v2225_v18 = vadd.f32 %v3115_v39, %v4408_v43  ;;  %v3118_v38 = vadd.f32 %v3117_v5, %v3116_v27  ;;  %3190 = vmatmul.mubr.bf16.gmra.mrb[92].mxu1 %v2274_v62 }
 0x3e5   :  { %3210 = vmatpush3.bf16.msra.mxu1 %v3731_v35 }
 0x3e6   :  { %v2228_v6 = vadd.f32 %v3118_v38, %v4408_v43  ;;  %3211 = vmatprep.subr.bf16.mxu1 %v3732_v63  ;;  %v2263_v7 = vmax.f32 %v2225_v18, 0.0 }
 0x3e8   :  { %v2264_v19 = vmax.f32 %v2228_v6, 0.0  ;;  %v3119_v45 = vpop.f32.mrb[76].mxu1 }
 0x3e9   :  { %v3120_v28 = vpop.f32.mrb[77].mxu1  ;;  %3212 = vmatpush3.bf16.msra.mxu1 %v3732_v63 }
 0x3ea   :  { %v3121_v42 = vadd.f32 %v3120_v28, %v3119_v45  ;;  %v3122_v55 = vpop.f32.mrb[78].mxu1  ;;  %v2275_v56 = vpack.c.bf16 %v2264_v19, %v2263_v7  ;;  %3213 = vmatprep.subr.bf16.mxu1 %v3733_v4 }
 0x3eb   :  { %v3123_v44 = vpop.f32.mrb[79].mxu1 }
 0x3ec   :  { %v2233_v8 = vadd.f32 %v3121_v42, %v4408_v43  ;;  %v3124_v29 = vadd.f32 %v3123_v44, %v3122_v55  ;;  %3193 = vmatprep.mubr.bf16.mxu1 %v2275_v56 }
 0x3ed   :  { %3214 = vmatpush3.bf16.msra.mxu1 %v3733_v4 }
 0x3ee   :  { %v2236_v9 = vadd.f32 %v3124_v29, %v4408_v43  ;;  %v2265_v10 = vmax.f32 %v2233_v8, 0.0  ;;  %3215 = vmatprep.subr.bf16.mxu1 %v3734_v15 }
 0x3f0   :  { %v2266_v20 = vmax.f32 %v2236_v9, 0.0  ;;  %v3125_v11 = vpop.f32.mrb[80].mxu1 }
 0x3f1   :  { %v3126_v21 = vpop.f32.mrb[81].mxu1  ;;  %3216 = vmatpush3.bf16.msra.mxu1 %v3734_v15 }
 0x3f2   :  { %v3127_v26 = vadd.f32 %v3126_v21, %v3125_v11  ;;  %v3128_v12 = vpop.f32.mrb[82].mxu1  ;;  %v2276_v13 = vpack.c.bf16 %v2266_v20, %v2265_v10 }
 0x3f3   :  { %v3129_v49 = vpop.f32.mrb[83].mxu1 }
 0x3f4   :  { %v2241_v52 = vadd.f32 %v3127_v26, %v4408_v43  ;;  %v3130_v57 = vadd.f32 %v3129_v49, %v3128_v12  ;;  %3194 = vmatmul.mubr.bf16.gmra.mrb[96].mxu1 %v2276_v13 }
 0x3f6   :  { %v2244_v48 = vadd.f32 %v3130_v57, %v4408_v43  ;;  %v2267_v54 = vmax.f32 %v2241_v52, 0.0 }
 0x3f8   :  { %v2268_v30 = vmax.f32 %v2244_v48, 0.0  ;;  %v3131_v59 = vpop.f32.mrb[84].mxu1 }
 0x3f9   :  { %v3132_v61 = vpop.f32.mrb[85].mxu1 }
 0x3fa   :  { %v3133_v22 = vadd.f32 %v3132_v61, %v3131_v59  ;;  %v3134_v0 = vpop.f32.mrb[86].mxu1  ;;  %v2277_v31 = vpack.c.bf16 %v2268_v30, %v2267_v54 }
 0x3fb   :  { %v3135_v1 = vpop.f32.mrb[87].mxu1 }
 0x3fc   :  { %v2249_v2 = vadd.f32 %v3133_v22, %v4408_v43  ;;  %v3136_v14 = vadd.f32 %v3135_v1, %v3134_v0  ;;  %3197 = vmatprep.mubr.bf16.mxu1 %v2277_v31 }
 0x3fe   :  { %v2252_v32 = vadd.f32 %v3136_v14, %v4408_v43  ;;  %v2269_v33 = vmax.f32 %v2249_v2, 0.0 }
 0x400   :  { %v2270_v23 = vmax.f32 %v2252_v32, 0.0  ;;  %v4430_v32 = vand.u32 127, %v300_v46 }
 0x402   :  { %v2278_v3 = vpack.c.bf16 %v2270_v23, %v2269_v33  ;;  %v3064_v33 = vld [vmem:[%s4613_s10] ss:$0 sm:$0xff]  ;;  %vm2641_vm0 = vcmp.lt.s32.totalorder %v4430_v32, 10  ;;  %s3976_s10 = smov [#allocation13]  }
 0x403   :  { %s2823_s24 = sshll.u32 %s3976_s10, 4  ;;  %s2824_s24 = int_to_ptr.vmem [resolvable:$true] %s2823_s24 }
 0x404   :  { %3198 = vmatmul.mubr.bf16.gmra.mrb[100].mxu1 %v2278_v3  ;;  %s3931_s29 = scalar_lea.vmem %s2824_s24, 2048  ;;  %p3936_p7 = scmp.lt.s32.totalorder %s2824_s24, %s2824_s24 }
 0x405   :  { %p3932_p6 = scmp.ne.s32.totalorder %s2824_s24, %s3931_s29  ;;  %p3937_p8 = scmp.lt.s32.totalorder %s3931_s29, %s3931_s29 }
 0x407   :  { %p3938_p9 = por %p3937_p8, %p3936_p7 }
 0x409   :  { %p3939_p10 = pnand %p3938_p9, %p3932_p6 }
 0x4a7   :  { %v3187_v37 = vpop.f32.mrb[88].mxu1 }
 0x4a8   :  { %v2393_v25 = vadd.f32 %v3187_v37, %v3055_v24  ;;  %v2384_v40 = vpop.f32.mrb[89].mxu1 }
 0x4a9   :  { %v2385_v16 = vadd.f32 %v3055_v24, %v2384_v40  ;;  %v3188_v41 = vpop.f32.mrb[90].mxu1 }
 0x4aa   :  { %v2396_v43 = vadd.f32 %v3188_v41, %v3055_v24  ;;  %v2387_v17 = vpop.f32.mrb[91].mxu1  ;;  %v2449_v47 = vmax.f32 %v2393_v25, 0.0 }
 0x4ab   :  { %v2388_v34 = vadd.f32 %v3055_v24, %v2387_v17  ;;  %v2447_v51 = vmax.f32 %v2385_v16, 0.0 }
 0x4ac   :  { %v2450_v50 = vmax.f32 %v2396_v43, 0.0 }
 0x4ad   :  { %v2448_v35 = vmax.f32 %v2388_v34, 0.0 }
 0x4ae   :  { %v2464_v53 = vpack.c.bf16 %v2450_v50, %v2449_v47 }
 0x4af   :  { %v2463_v58 = vpack.c.bf16 %v2448_v35, %v2447_v51 }
 0x4b1   :  { %3217 = vmatprep.mubr.bf16.mxu1 %v2463_v58 }
 0x4b2   :  { %3218 = vmatmul.mubr.bf16.vlgmr.msra.gmra.mrb[104].mxu1 %v2464_v53 }
 0x4b7   :  { %v3191_v36 = vpop.f32.mrb[92].mxu1 }
 0x4b8   :  { %v2409_v60 = vadd.f32 %v3191_v36, %v3055_v24  ;;  %v2400_v39 = vpop.f32.mrb[93].mxu1 }
 0x4b9   :  { %v2401_v27 = vadd.f32 %v3055_v24, %v2400_v39  ;;  %v3192_v62 = vpop.f32.mrb[94].mxu1 }
 0x4ba   :  { %v2412_v63 = vadd.f32 %v3192_v62, %v3055_v24  ;;  %v2403_v5 = vpop.f32.mrb[95].mxu1  ;;  %v2453_v38 = vmax.f32 %v2409_v60, 0.0 }
 0x4bb   :  { %v2404_v18 = vadd.f32 %v3055_v24, %v2403_v5  ;;  %v2451_v7 = vmax.f32 %v2401_v27, 0.0 }
 0x4bc   :  { %v2454_v6 = vmax.f32 %v2412_v63, 0.0 }
 0x4bd   :  { %v2452_v19 = vmax.f32 %v2404_v18, 0.0 }
 0x4be   :  { %v2466_v45 = vpack.c.bf16 %v2454_v6, %v2453_v38 }
 0x4bf   :  { %v2465_v28 = vpack.c.bf16 %v2452_v19, %v2451_v7 }
 0x4c1   :  { %3221 = vmatprep.mubr.bf16.mxu1 %v2465_v28 }
 0x4c2   :  { %3222 = vmatmul.mubr.bf16.gmra.mrb[108].mxu1 %v2466_v45 }
 0x4c7   :  { %v3195_v42 = vpop.f32.mrb[96].mxu1 }
 0x4c8   :  { %v2425_v55 = vadd.f32 %v3195_v42, %v3055_v24  ;;  %v2416_v56 = vpop.f32.mrb[97].mxu1 }
 0x4c9   :  { %v2417_v44 = vadd.f32 %v3055_v24, %v2416_v56  ;;  %v3196_v8 = vpop.f32.mrb[98].mxu1 }
 0x4ca   :  { %v2428_v29 = vadd.f32 %v3196_v8, %v3055_v24  ;;  %v2419_v9 = vpop.f32.mrb[99].mxu1  ;;  %v2457_v20 = vmax.f32 %v2425_v55, 0.0 }
 0x4cb   :  { %v2420_v10 = vadd.f32 %v3055_v24, %v2419_v9  ;;  %v2455_v21 = vmax.f32 %v2417_v44, 0.0 }
 0x4cc   :  { %v2458_v11 = vmax.f32 %v2428_v29, 0.0 }
 0x4cd   :  { %v2456_v26 = vmax.f32 %v2420_v10, 0.0 }
 0x4ce   :  { %v2468_v12 = vpack.c.bf16 %v2458_v11, %v2457_v20 }
 0x4cf   :  { %v2467_v13 = vpack.c.bf16 %v2456_v26, %v2455_v21 }
 0x4d1   :  { %3225 = vmatprep.mubr.bf16.mxu1 %v2467_v13 }
 0x4d2   :  { %3226 = vmatmul.mubr.bf16.gmra.mrb[112].mxu1 %v2468_v12 }
 0x4d7   :  { %v3199_v49 = vpop.f32.mrb[100].mxu1 }
 0x4d8   :  { %v2441_v52 = vadd.f32 %v3199_v49, %v3055_v24  ;;  %v2432_v57 = vpop.f32.mrb[101].mxu1 }
 0x4d9   :  { %v2433_v48 = vadd.f32 %v3055_v24, %v2432_v57  ;;  %v3200_v54 = vpop.f32.mrb[102].mxu1 }
 0x4da   :  { %v2444_v30 = vadd.f32 %v3200_v54, %v3055_v24  ;;  %v2435_v59 = vpop.f32.mrb[103].mxu1  ;;  %v2461_v22 = vmax.f32 %v2441_v52, 0.0 }
 0x4db   :  { %v2436_v61 = vadd.f32 %v3055_v24, %v2435_v59  ;;  %v2459_v31 = vmax.f32 %v2433_v48, 0.0 }
 0x4dc   :  { %v2462_v0 = vmax.f32 %v2444_v30, 0.0 }
 0x4dd   :  { %v2460_v1 = vmax.f32 %v2436_v61, 0.0 }
 0x4de   :  { %v2470_v2 = vpack.c.bf16 %v2462_v0, %v2461_v22 }
 0x4df   :  { %v2469_v14 = vpack.c.bf16 %v2460_v1, %v2459_v31 }
 0x4e1   :  { %3229 = vmatprep.mubr.bf16.mxu1 %v2469_v14 }
 0x4e2   :  { %3230 = vmatmul.mubr.bf16.gmra.mrb[116].mxu1 %v2470_v2 }
 0x585   :  { %v3219_v23 = vpop.f32.mrb[104].mxu1 }
 0x586   :  { %v2585_v3 = vadd.f32 %v3219_v23, %v3064_v33  ;;  %v2576_v4 = vpop.f32.mrb[105].mxu1 }
 0x587   :  { %v2577_v15 = vadd.f32 %v3064_v33, %v2576_v4  ;;  %v3220_v24 = vpop.f32.mrb[106].mxu1 }
 0x588   :  { %v2588_v37 = vadd.f32 %v3220_v24, %v3064_v33  ;;  %v2579_v25 = vpop.f32.mrb[107].mxu1  ;;  %v2644_v40 = vsel %vm2641_vm0, %v2585_v3, -inf }
 0x589   :  { %v2580_v16 = vadd.f32 %v3064_v33, %v2579_v25  ;;  %2662 = vmax.xlane.f32.xlu1 %v2644_v40  ;;  %v2642_v46 = vsel %vm2641_vm0, %v2577_v15, -inf }
 0x58a   :  { %2658 = vmax.xlane.f32.xlu0 %v2642_v46  ;;  %v4442_v41 = vsel %vm2641_vm0, %v2588_v37, -inf }
 0x58b   :  { %v4447_v43 = vsel %vm2641_vm0, %v2580_v16, -inf }
 0x58d   :  { %2664 = vmax.xlane.f32.xlu1 %v4442_v41 }
 0x58e   :  { %2660 = vmax.xlane.f32.xlu0 %v4447_v43 }
 0x595   :  { %v3223_v17 = vpop.f32.mrb[108].mxu1 }
 0x596   :  { %v2601_v34 = vadd.f32 %v3223_v17, %v3064_v33  ;;  %v2592_v47 = vpop.f32.mrb[109].mxu1 }
 0x597   :  { %v3224_v50 = vpop.f32.mrb[110].mxu1  ;;  %v2593_v51 = vadd.f32 %v3064_v33, %v2592_v47 }
 0x598   :  { %v2604_v35 = vadd.f32 %v3224_v50, %v3064_v33  ;;  %v2595_v53 = vpop.f32.mrb[111].mxu1  ;;  %v4452_v58 = vsel %vm2641_vm0, %v2601_v34, -inf }
 0x599   :  { %2670 = vmax.xlane.f32.xlu0 %v4452_v58  ;;  %v2596_v36 = vadd.f32 %v3064_v33, %v2595_v53  ;;  %v4462_v39 = vsel %vm2641_vm0, %v2593_v51, -inf }
 0x59a   :  { %v4457_v60 = vsel %vm2641_vm0, %v2604_v35, -inf }
 0x59b   :  { %2672 = vmax.xlane.f32.xlu1 %v4457_v60  ;;  %v4467_v27 = vsel %vm2641_vm0, %v2596_v36, -inf }
 0x59d   :  { %2666 = vmax.xlane.f32.xlu0 %v4462_v39 }
 0x59f   :  { %2668 = vmax.xlane.f32.xlu1 %v4467_v27 }
 0x5a5   :  { %v3227_v62 = vpop.f32.mrb[112].mxu1 }
 0x5a6   :  { %v2617_v63 = vadd.f32 %v3227_v62, %v3064_v33  ;;  %v2608_v5 = vpop.f32.mrb[113].mxu1 }
 0x5a7   :  { %v3228_v18 = vpop.f32.mrb[114].mxu1  ;;  %v2609_v38 = vadd.f32 %v3064_v33, %v2608_v5 }
 0x5a8   :  { %v2620_v6 = vadd.f32 %v3228_v18, %v3064_v33  ;;  %v2611_v7 = vpop.f32.mrb[115].mxu1  ;;  %v4472_v19 = vsel %vm2641_vm0, %v2617_v63, -inf }
 0x5a9   :  { %2678 = vmax.xlane.f32.xlu0 %v4472_v19  ;;  %v2612_v45 = vadd.f32 %v3064_v33, %v2611_v7  ;;  %v4482_v42 = vsel %vm2641_vm0, %v2609_v38, -inf }
 0x5aa   :  { %v4477_v28 = vsel %vm2641_vm0, %v2620_v6, -inf }
 0x5ab   :  { %2680 = vmax.xlane.f32.xlu1 %v4477_v28  ;;  %v4487_v55 = vsel %vm2641_vm0, %v2612_v45, -inf }
 0x5ad   :  { %2674 = vmax.xlane.f32.xlu0 %v4482_v42 }
 0x5af   :  { %2676 = vmax.xlane.f32.xlu1 %v4487_v55 }
 0x5b5   :  { %v3231_v56 = vpop.f32.mrb[116].mxu1 }
 0x5b6   :  { %v2624_v44 = vpop.f32.mrb[117].mxu1  ;;  %v2633_v10 = vadd.f32 %v3231_v56, %v3064_v33 }
 0x5b7   :  { %v2625_v8 = vadd.f32 %v3064_v33, %v2624_v44  ;;  %v3232_v29 = vpop.f32.mrb[118].mxu1 }
 0x5b8   :  { %v2627_v9 = vpop.f32.mrb[119].mxu1  ;;  %v2636_v21 = vadd.f32 %v3232_v29, %v3064_v33  ;;  %v4502_v12 = vsel %vm2641_vm0, %v2633_v10, -inf }
 0x5b9   :  { %v2628_v20 = vadd.f32 %v3064_v33, %v2627_v9  ;;  %v4492_v11 = vsel %vm2641_vm0, %v2625_v8, -inf }
 0x5ba   :  { %2682 = vmax.xlane.f32.xlu0 %v4492_v11  ;;  %v4507_v13 = vsel %vm2641_vm0, %v2636_v21, -inf }
 0x5bb   :  { %v4497_v26 = vsel %vm2641_vm0, %v2628_v20, -inf }
 0x5bc   :  { %2684 = vmax.xlane.f32.xlu1 %v4497_v26 }
 0x5be   :  { %2686 = vmax.xlane.f32.xlu0 %v4502_v12 }
 0x5c0   :  { %2688 = vmax.xlane.f32.xlu1 %v4507_v13 }
 0x616   :  { %v2663_v49 = vpop.xlane.xlu1 %2662 }
 0x617   :  { %v2692_v52 = vsub.f32 %v2644_v40, %v2663_v49  ;;  %v2659_v57 = vpop.xlane.xlu0 %2658 }
 0x618   :  { %v2690_v48 = vsub.f32 %v2642_v46, %v2659_v57 }
 0x619   :  { %v2710_v54 = vmul.f32 1.442695, %v2692_v52 }
 0x61a   :  { %v2706_v30 = vmul.f32 1.442695, %v2690_v48  ;;  %v2665_v59 = vpop.xlane.xlu1 %2664 }
 0x61b   :  { %3735 = vpow2.f32 %v2710_v54  ;;  %v2693_v61 = vsub.f32 %v4442_v41, %v2665_v59  ;;  %v2661_v22 = vpop.xlane.xlu0 %2660 }
 0x61c   :  { %v2691_v0 = vsub.f32 %v4447_v43, %v2661_v22  ;;  %3737 = vpow2.f32 %v2706_v30 }
 0x61d   :  { %v2712_v31 = vmul.f32 1.442695, %v2693_v61 }
 0x61e   :  { %v2708_v1 = vmul.f32 1.442695, %v2691_v0 }
 0x61f   :  { %3739 = vpow2.f32 %v2712_v31 }
 0x620   :  { %3741 = vpow2.f32 %v2708_v1 }
 0x625   :  { %v4512_v2 = vpop.eup %3735 }
 0x626   :  { %v2671_v14 = vpop.xlane.xlu0 %2670  ;;  %2742 = vadd.xlane.f32.xlu0 %v4512_v2  ;;  %v4516_v33 = vpop.eup %3737 }
 0x627   :  { %v2696_v32 = vsub.f32 %v4452_v58, %v2671_v14 }
 0x628   :  { %v2673_v23 = vpop.xlane.xlu1 %2672 }
 0x629   :  { %v4518_v3 = vpop.eup %3739  ;;  %v2718_v4 = vmul.f32 1.442695, %v2696_v32  ;;  %v2697_v15 = vsub.f32 %v4457_v60, %v2673_v23 }
 0x62a   :  { %v2667_v24 = vpop.xlane.xlu0 %2666  ;;  %2744 = vadd.xlane.f32.xlu1 %v4518_v3  ;;  %2738 = vadd.xlane.f32.xlu0 %v4516_v33  ;;  %v4524_v16 = vpop.eup %3741 }
 0x62b   :  { %3743 = vpow2.f32 %v2718_v4  ;;  %v2720_v37 = vmul.f32 1.442695, %v2697_v15  ;;  %v2694_v25 = vsub.f32 %v4462_v39, %v2667_v24 }
 0x62c   :  { %v2669_v40 = vpop.xlane.xlu1 %2668 }
 0x62d   :  { %3745 = vpow2.f32 %v2720_v37  ;;  %v2714_v46 = vmul.f32 1.442695, %v2694_v25  ;;  %v2695_v41 = vsub.f32 %v4467_v27, %v2669_v40 }
 0x62e   :  { %2740 = vadd.xlane.f32.xlu1 %v4524_v16 }
 0x62f   :  { %3747 = vpow2.f32 %v2714_v46  ;;  %v2716_v43 = vmul.f32 1.442695, %v2695_v41 }
 0x631   :  { %3749 = vpow2.f32 %v2716_v43 }
 0x635   :  { %v4528_v17 = vpop.eup %3743 }
 0x636   :  { %v2679_v34 = vpop.xlane.xlu0 %2678  ;;  %2750 = vadd.xlane.f32.xlu0 %v4528_v17 }
 0x637   :  { %v4531_v47 = vpop.eup %3745  ;;  %v2700_v50 = vsub.f32 %v4472_v19, %v2679_v34 }
 0x638   :  { %v2681_v51 = vpop.xlane.xlu1 %2680  ;;  %2752 = vadd.xlane.f32.xlu1 %v4531_v47 }
 0x639   :  { %v4535_v35 = vpop.eup %3747  ;;  %v2726_v53 = vmul.f32 1.442695, %v2700_v50  ;;  %v2701_v58 = vsub.f32 %v4477_v28, %v2681_v51 }
 0x63a   :  { %v2675_v36 = vpop.xlane.xlu0 %2674  ;;  %2746 = vadd.xlane.f32.xlu0 %v4535_v35 }
 0x63b   :  { %v4539_v60 = vpop.eup %3749  ;;  %3751 = vpow2.f32 %v2726_v53  ;;  %v2728_v39 = vmul.f32 1.442695, %v2701_v58  ;;  %v2698_v27 = vsub.f32 %v4482_v42, %v2675_v36 }
 0x63c   :  { %v2677_v62 = vpop.xlane.xlu1 %2676  ;;  %2748 = vadd.xlane.f32.xlu1 %v4539_v60 }
 0x63d   :  { %3753 = vpow2.f32 %v2728_v39  ;;  %v2722_v63 = vmul.f32 1.442695, %v2698_v27  ;;  %v2699_v5 = vsub.f32 %v4487_v55, %v2677_v62 }
 0x63f   :  { %3755 = vpow2.f32 %v2722_v63  ;;  %v2724_v18 = vmul.f32 1.442695, %v2699_v5 }
 0x641   :  { %3757 = vpow2.f32 %v2724_v18 }
 0x645   :  { %v4544_v38 = vpop.eup %3751 }
 0x646   :  { %2758 = vadd.xlane.f32.xlu0 %v4544_v38 }
 0x647   :  { %v4547_v6 = vpop.eup %3753  ;;  %v2683_v7 = vpop.xlane.xlu0 %2682 }
 0x648   :  { %v2702_v19 = vsub.f32 %v4492_v11, %v2683_v7  ;;  %2760 = vadd.xlane.f32.xlu1 %v4547_v6 }
 0x649   :  { %v4551_v45 = vpop.eup %3755  ;;  %v2685_v28 = vpop.xlane.xlu1 %2684 }
 0x64a   :  { %v2730_v42 = vmul.f32 1.442695, %v2702_v19  ;;  %v2703_v55 = vsub.f32 %v4497_v26, %v2685_v28  ;;  %2754 = vadd.xlane.f32.xlu0 %v4551_v45 }
 0x64b   :  { %v4555_v56 = vpop.eup %3757  ;;  %v2687_v44 = vpop.xlane.xlu0 %2686 }
 0x64c   :  { %3759 = vpow2.f32 %v2730_v42  ;;  %v2732_v8 = vmul.f32 1.442695, %v2703_v55  ;;  %v2704_v29 = vsub.f32 %v4502_v12, %v2687_v44  ;;  %2756 = vadd.xlane.f32.xlu1 %v4555_v56 }
 0x64d   :  { %v2689_v9 = vpop.xlane.xlu1 %2688 }
 0x64e   :  { %3761 = vpow2.f32 %v2732_v8  ;;  %v2734_v10 = vmul.f32 1.442695, %v2704_v29  ;;  %v2705_v20 = vsub.f32 %v4507_v13, %v2689_v9 }
 0x650   :  { %3763 = vpow2.f32 %v2734_v10  ;;  %v2736_v11 = vmul.f32 1.442695, %v2705_v20 }
 0x652   :  { %3765 = vpow2.f32 %v2736_v11 }
 0x656   :  { %v4560_v21 = vpop.eup %3759 }
 0x657   :  { %2762 = vadd.xlane.f32.xlu0 %v4560_v21 }
 0x658   :  { %v4563_v26 = vpop.eup %3761 }
 0x659   :  { %2764 = vadd.xlane.f32.xlu1 %v4563_v26 }
 0x65a   :  { %v4566_v49 = vpop.eup %3763 }
 0x65b   :  { %2766 = vadd.xlane.f32.xlu0 %v4566_v49 }
 0x65c   :  { %v4569_v12 = vpop.eup %3765 }
 0x65d   :  { %2768 = vadd.xlane.f32.xlu1 %v4569_v12 }
 0x6b3   :  { %v2743_v13 = vpop.xlane.xlu0 %2742 }
 0x6b4   :  { %3767 = vrcp.f32 %v2743_v13 }
 0x6b7   :  { %v2745_v52 = vpop.xlane.xlu1 %2744  ;;  %v2739_v57 = vpop.xlane.xlu0 %2738 }
 0x6b8   :  { %3769 = vrcp.f32 %v2745_v52 }
 0x6b9   :  { %3771 = vrcp.f32 %v2739_v57 }
 0x6bb   :  { %v2741_v48 = vpop.xlane.xlu1 %2740 }
 0x6bc   :  { %3773 = vrcp.f32 %v2741_v48 }
 0x6be   :  { %v3768_v54 = vpop.eup %3767 }
 0x6bf   :  { %v2775_v30 = vmul.f32 %v3768_v54, %v4512_v2 }
 0x6c1   :  { %2804 = vst [vmem:[#allocation13 + $0x10] sm:$0xff] %v2775_v30 }
 0x6c2   :  { %v3770_v59 = vpop.eup %3769 }
 0x6c3   :  { %v3772_v61 = vpop.eup %3771  ;;  %v2777_v22 = vmul.f32 %v3770_v59, %v4518_v3  ;;  %v2751_v0 = vpop.xlane.xlu0 %2750 }
 0x6c4   :  { %v2771_v31 = vmul.f32 %v3772_v61, %v4516_v33  ;;  %3775 = vrcp.f32 %v2751_v0 }
 0x6c5   :  { %2805 = vst [vmem:[#allocation13 + $0x18] sm:$0xff] %v2777_v22  ;;  %v2753_v1 = vpop.xlane.xlu1 %2752 }
 0x6c6   :  { %v3774_v14 = vpop.eup %3773  ;;  %2802 = vst [vmem:[#allocation13] sm:$0xff] %v2771_v31  ;;  %3777 = vrcp.f32 %v2753_v1 }
 0x6c7   :  { %v2773_v32 = vmul.f32 %v3774_v14, %v4524_v16  ;;  %v2747_v23 = vpop.xlane.xlu0 %2746 }
 0x6c8   :  { %3779 = vrcp.f32 %v2747_v23 }
 0x6c9   :  { %2803 = vst [vmem:[#allocation13 + $0x8] sm:$0xff] %v2773_v32  ;;  %v2749_v2 = vpop.xlane.xlu1 %2748 }
 0x6ca   :  { %3781 = vrcp.f32 %v2749_v2 }
 0x6ce   :  { %v3776_v4 = vpop.eup %3775 }
 0x6cf   :  { %v2783_v15 = vmul.f32 %v3776_v4, %v4528_v17 }
 0x6d0   :  { %v3778_v3 = vpop.eup %3777 }
 0x6d1   :  { %2808 = vst [vmem:[#allocation13 + $0x30] sm:$0xff] %v2783_v15  ;;  %v2785_v33 = vmul.f32 %v3778_v3, %v4531_v47 }
 0x6d2   :  { %v3780_v24 = vpop.eup %3779 }
 0x6d3   :  { %2809 = vst [vmem:[#allocation13 + $0x38] sm:$0xff] %v2785_v33  ;;  %v2779_v37 = vmul.f32 %v3780_v24, %v4535_v35  ;;  %v2759_v25 = vpop.xlane.xlu0 %2758 }
 0x6d4   :  { %v3782_v40 = vpop.eup %3781  ;;  %3783 = vrcp.f32 %v2759_v25 }
 0x6d5   :  { %2806 = vst [vmem:[#allocation13 + $0x20] sm:$0xff] %v2779_v37  ;;  %v2781_v16 = vmul.f32 %v3782_v40, %v4539_v60  ;;  %v2761_v46 = vpop.xlane.xlu1 %2760 }
 0x6d6   :  { %3785 = vrcp.f32 %v2761_v46 }
 0x6d7   :  { %2807 = vst [vmem:[#allocation13 + $0x28] sm:$0xff] %v2781_v16  ;;  %v2755_v41 = vpop.xlane.xlu0 %2754 }
 0x6d8   :  { %3787 = vrcp.f32 %v2755_v41 }
 0x6d9   :  { %v2757_v43 = vpop.xlane.xlu1 %2756 }
 0x6da   :  { %3789 = vrcp.f32 %v2757_v43 }
 0x6de   :  { %v3784_v17 = vpop.eup %3783 }
 0x6df   :  { %v2791_v34 = vmul.f32 %v3784_v17, %v4544_v38 }
 0x6e0   :  { %v3786_v47 = vpop.eup %3785 }
 0x6e1   :  { %2812 = vst [vmem:[#allocation13 + $0x50] sm:$0xff] %v2791_v34  ;;  %v2793_v50 = vmul.f32 %v3786_v47, %v4547_v6 }
 0x6e2   :  { %v3788_v51 = vpop.eup %3787 }
 0x6e3   :  { %2813 = vst [vmem:[#allocation13 + $0x58] sm:$0xff] %v2793_v50  ;;  %v2787_v35 = vmul.f32 %v3788_v51, %v4551_v45 }
 0x6e4   :  { %v3790_v53 = vpop.eup %3789  ;;  %v2763_v58 = vpop.xlane.xlu0 %2762 }
 0x6e5   :  { %2810 = vst [vmem:[#allocation13 + $0x40] sm:$0xff] %v2787_v35  ;;  %v2789_v36 = vmul.f32 %v3790_v53, %v4555_v56  ;;  %3791 = vrcp.f32 %v2763_v58 }
 0x6e6   :  { %v2765_v60 = vpop.xlane.xlu1 %2764 }
 0x6e7   :  { %2811 = vst [vmem:[#allocation13 + $0x48] sm:$0xff] %v2789_v36  ;;  %3793 = vrcp.f32 %v2765_v60 }
 0x6e8   :  { %v2767_v39 = vpop.xlane.xlu0 %2766 }
 0x6e9   :  { %3795 = vrcp.f32 %v2767_v39 }
 0x6ea   :  { %v2769_v27 = vpop.xlane.xlu1 %2768 }
 0x6eb   :  { %3797 = vrcp.f32 %v2769_v27 }
 0x6ef   :  { %v3792_v62 = vpop.eup %3791 }
 0x6f0   :  { %v2795_v63 = vmul.f32 %v3792_v62, %v4560_v21 }
 0x6f1   :  { %v3794_v5 = vpop.eup %3793 }
 0x6f2   :  { %2814 = vst [vmem:[#allocation13 + $0x60] sm:$0xff] %v2795_v63  ;;  %v2797_v18 = vmul.f32 %v3794_v5, %v4563_v26 }
 0x6f3   :  { %v3796_v38 = vpop.eup %3795 }
 0x6f4   :  { %2815 = vst [vmem:[#allocation13 + $0x68] sm:$0xff] %v2797_v18  ;;  %v2799_v6 = vmul.f32 %v3796_v38, %v4566_v49 }
 0x6f5   :  { %v3798_v7 = vpop.eup %3797 }
 0x6f6   :  { %2816 = vst [vmem:[#allocation13 + $0x70] sm:$0xff] %v2799_v6  ;;  %v2801_v19 = vmul.f32 %v3798_v7, %v4569_v12 }
 0x6f8   :  { %2817 = vst [vmem:[#allocation13 + $0x78] sm:$0xff] %v2801_v19 }
 0x6f9   :  { %3942 = shalt.err (!%p3939_p10)
}
 0x6fa   :  { %s3943_s23 = scalar_lea.hbm %s4614_s11, 2048 }
 0x6fb   :  { %p3944_p11 = scmp.ne.s32.totalorder %s4614_s11, %s3943_s23  ;;  %p3947_p12 = scmp.lt.u32.totalorder %s3943_s23, %s4614_s11 }
 0x6fd   :  { %p3949_p13 = pnand %p3947_p12, %p3944_p11 }
 0x6ff   :  { %3952 = shalt.err (!%p3949_p13)
}
 0x700   :  { %2829 = dma.vmem_to_hbm [thread:$0]  %s2824_s24, 2048, %s4614_s11, [#allocation4], %s3964_s27, %s3964_s27, %s3965_s28  }
 0x701   :  { %3961 = dma.done.wait [#allocation4], 2048  }
 0x702   :  { %3962 = vsyncadd [#allocation4], 4294965248 }
 0x703   :  { %2833 = vsyncpa [#allocation3], 1 }
 0x704   :  { %2834 = vsyncpa [#allocation6], 1 }
 0x705   :  { %2835 = vsyncpa [#allocation9], 1 }
 0x706   :  { %2836 = vsyncpa [#allocation12], 1 }
 0x707   :  { %2837 = vsyncpa [#allocation4], 1 }

</bundles_post_ra>
